<compile_context>
chip_gen: v7x
topology: tpu7x:2x2x1
jax: 0.10.0
libtpu: 0.0.40
codegen_flags: <defaults>
</compile_context>

<pallas_src>
from functools import partial

import jax
import jax.numpy as jnp
from jax.experimental import pallas as pl
from jax.experimental.pallas import tpu as pltpu


# ----------------------------------------------------------------------------
# Kernel: one Conv3x3(pad=1) + folded-BN + ReLU step on a lane-dense spatial
# tile.  The 3x3 taps are formed in-kernel from two consecutive blocks of the
# flattened, zero-padded input (no im2col materialization in HBM).
# ----------------------------------------------------------------------------
def _conv3x3_bn_relu_kernel(xa_ref, xb_ref, w_ref, shift_ref, mask_ref, o_ref, *, wp):
    # xa_ref, xb_ref: (C_in, TC) bf16 -- blocks j and j+1 of the flattened padded
    #                 input; together they cover every tap offset (<= 2*Wp+2 < TC).
    # w_ref:          (9, C_out, C_in) bf16 -- BN-scale-folded weights, t = dy*3+dx.
    # shift_ref:      (C_out, 1) f32  -- folded conv bias + BN shift.
    # mask_ref:       (1, TC)  f32    -- 1 on interior pixels, 0 on padding/garbage.
    # o_ref:          (C_out, TC)     -- lane-dense output tile.
    tc = o_ref.shape[-1]
    x = jnp.concatenate([xa_ref[...], xb_ref[...]], axis=-1)          # (C_in, 2*TC)
    acc = jnp.zeros(o_ref.shape, jnp.float32)
    for dy in range(3):
        for dx in range(3):
            s = dy * wp + dx                                          # static tap offset
            acc = acc + jnp.dot(w_ref[dy * 3 + dx],                   # (C_out, C_in)
                                x[:, s:s + tc],                       # (C_in, TC)
                                preferred_element_type=jnp.float32)
    y = jnp.maximum(acc + shift_ref[...], 0.0) * mask_ref[...]        # shift, ReLU, border mask
    o_ref[...] = y.astype(o_ref.dtype)


# ----------------------------------------------------------------------------
# Per-layer pallas_call wrapper.
# ----------------------------------------------------------------------------
def _conv_bn_relu_layer(xin, w9, shift, mask, *, wp, tc, n_blocks, out_dtype, vmem_limit):
    n, c_in, l_in = xin.shape
    c_out = w9.shape[1]
    assert l_in >= (n_blocks + 1) * tc, (l_in, n_blocks, tc)

    kernel = partial(_conv3x3_bn_relu_kernel, wp=wp)
    return pl.pallas_call(
        kernel,
        out_shape=jax.ShapeDtypeStruct((n, c_out, n_blocks * tc), out_dtype),
        grid_spec=pltpu.PrefetchScalarGridSpec(
            num_scalar_prefetch=0,
            grid=(n, n_blocks),
            in_specs=[
                # same flattened input passed twice: blocks j and j+1 (halo).
                pl.BlockSpec((None, c_in, tc), lambda b, j: (b, 0, j)),
                pl.BlockSpec((None, c_in, tc), lambda b, j: (b, 0, j + 1)),
                # grid-invariant operands: single-buffered.
                pl.BlockSpec((9, c_out, c_in), lambda b, j: (0, 0, 0),
                             pipeline_mode=pl.Buffered(1)),
                pl.BlockSpec((c_out, 1), lambda b, j: (0, 0),
                             pipeline_mode=pl.Buffered(1)),
                # interior/border mask, streamed with the output tile.
                pl.BlockSpec((1, tc), lambda b, j: (0, j)),
            ],
            out_specs=pl.BlockSpec((None, c_out, tc), lambda b, j: (b, 0, j)),
        ),
        compiler_params=pltpu.CompilerParams(
            dimension_semantics=("parallel", "parallel"),
            vmem_limit_bytes=vmem_limit),
    )(xin, xin, w9, shift, mask)


# ----------------------------------------------------------------------------
# Tiling / layout helpers (wrapper side).
# ----------------------------------------------------------------------------
def _pick_col_tile(wp, c_a, c_b, *, spatial, budget_bytes=32 * 1024 * 1024, cap=2048):
    """Largest multiple-of-128 lane tile that (a) covers the 3x3 halo (>= 2*Wp+2),
    (b) keeps the double-buffered streaming blocks inside a VMEM budget, and
    (c) does not wildly overshoot the flattened spatial extent."""
    # per-column bytes, double-buffered: 2 bf16 tap blocks + f32 output + f32 mask
    per_col = 2 * (2 * c_a * 2 + c_b * 4 + 4)
    tc = max(128, (budget_bytes // per_col) // 128 * 128)
    tc = min(tc, cap, max(128, pl.cdiv(spatial, 128) * 128))
    tc_min = pl.cdiv(2 * wp + 2, 128) * 128          # halo must fit in one extra block
    return max(tc, tc_min)


def _border_mask(length, head, h, w, wp):
    """1.0 where index+head maps to an interior pixel of the (H+2, W+2) padded
    image, 0.0 on the padding ring / flat-axis tail."""
    p = jnp.arange(length, dtype=jnp.int32) + head
    y = p // wp
    x = p % wp
    m = (y >= 1) & (y <= h) & (x >= 1) & (x <= w)
    return m.astype(jnp.float32).reshape(1, length)


def _fold_conv_bn(conv, bn):
    """Fold BN scale into the conv weight and (bias, mean, beta) into a shift."""
    w, b = conv["w"], conv["b"]                       # (C_out, C_in, 3, 3), (C_out,)
    c_o, c_i = w.shape[0], w.shape[1]
    scale = bn["gamma"] / jnp.sqrt(bn["var"] + bn["eps"])          # (C_out,)
    w9 = (w * scale[:, None, None, None]).transpose(2, 3, 0, 1).reshape(9, c_o, c_i)
    shift = (scale * (b - bn["mean"]) + bn["beta"]).reshape(c_o, 1)
    return w9.astype(jnp.bfloat16), shift.astype(jnp.float32)


# ----------------------------------------------------------------------------
# DoubleConv forward.
# ----------------------------------------------------------------------------
def double_conv_forward(x_nchw, params):
    """x_nchw: (N, C_in, H, W) float32 -> (N, C_out, H, W) float32."""
    n, c_in, h, w = x_nchw.shape
    hp, wp = h + 2, w + 2
    c_mid = params["conv1"]["w"].shape[0]
    c_out = params["conv2"]["w"].shape[0]

    tc = _pick_col_tile(wp, max(c_in, c_mid), max(c_mid, c_out), spatial=h * wp)
    n2 = pl.cdiv(h * wp, tc)      # output blocks of layer 2 (covers all valid pixels)
    n1 = n2 + 1                   # layer-1 output must also cover layer-2's j+1 halo block
    l_out1 = n1 * tc
    l_out2 = n2 * tc
    l_in1 = (n1 + 1) * tc

    # Layer-1 input: zero-padded image flattened per (image, channel), with a
    # (Wp+1)-element head so every tap offset dy*Wp+dx is non-negative, and a
    # zero tail rounding the axis up to a block multiple.
    xpad = jnp.pad(x_nchw, ((0, 0), (0, 0), (1, 1), (1, 1))).astype(jnp.bfloat16)
    xflat = xpad.reshape(n, c_in, hp * wp)
    xin1 = jnp.pad(xflat, ((0, 0), (0, 0), (wp + 1, l_in1 - hp * wp - (wp + 1))))

    # Interior masks (layer 2's output is stored shifted by -(Wp+1), hence head=Wp+1).
    mask1 = _border_mask(l_out1, 0, h, w, wp)
    mask2 = _border_mask(l_out2, wp + 1, h, w, wp)

    w9_1, sh1 = _fold_conv_bn(params["conv1"], params["bn1"])
    w9_2, sh2 = _fold_conv_bn(params["conv2"], params["bn2"])

    vmem_limit = 56 * 1024 * 1024

    # Layer 1: output in the padded flat layout, borders masked to exact zeros,
    # bf16 -- it is consumed directly (zero padding included) by layer 2.
    h1 = _conv_bn_relu_layer(xin1, w9_1, sh1, mask1, wp=wp, tc=tc, n_blocks=n1,
                             out_dtype=jnp.bfloat16, vmem_limit=vmem_limit)
    # Layer 2: output stored at u = p - (Wp+1), i.e. u = y*Wp + x for valid pixels.
    out2 = _conv_bn_relu_layer(h1, w9_2, sh2, mask2, wp=wp, tc=tc, n_blocks=n2,
                               out_dtype=jnp.float32, vmem_limit=vmem_limit)

    return out2[:, :, :h * wp].reshape(n, c_out, h, wp)[..., :w]


# ----------------------------------------------------------------------------
# Parameter init (mirrors PyTorch shapes / init style, deterministic).
# ----------------------------------------------------------------------------
def init_params(key, in_channels, out_channels, mid_channels=None):
    if mid_channels is None:
        mid_channels = out_channels
    k1, k2, k3, k4 = jax.random.split(key, 4)

    def conv_w(k, cout, cin):
        fan_in = cin * 9
        bound = (6.0 / fan_in) ** 0.5                 # kaiming-uniform
        return jax.random.uniform(k, (cout, cin, 3, 3), jnp.float32, -bound, bound)

    def bn(k, c):
        return {
            "gamma": 1.0 + 0.02 * jax.random.normal(k, (c,), jnp.float32),
            "beta": jnp.zeros((c,), jnp.float32),
            "mean": jnp.zeros((c,), jnp.float32),
            "var": jnp.ones((c,), jnp.float32),
            "eps": jnp.float32(1e-5),
        }

    return {
        "conv1": {"w": conv_w(k1, mid_channels, in_channels),
                  "b": jnp.zeros((mid_channels,), jnp.float32)},
        "bn1": bn(k2, mid_channels),
        "conv2": {"w": conv_w(k3, out_channels, mid_channels),
                  "b": jnp.zeros((out_channels,), jnp.float32)},
        "bn2": bn(k4, out_channels),
    }


# ----------------------------------------------------------------------------
# Pure-JAX f32 reference for correctness check.
# ----------------------------------------------------------------------------
def _reference(x, params):
    def layer(x, conv, bnp):
        y = jax.lax.conv_general_dilated(
            x, conv["w"], window_strides=(1, 1), padding=((1, 1), (1, 1)),
            dimension_numbers=("NCHW", "OIHW", "NCHW"),
            precision=jax.lax.Precision.HIGHEST)
        y = y + conv["b"][None, :, None, None]
        scale = bnp["gamma"] / jnp.sqrt(bnp["var"] + bnp["eps"])
        shift = bnp["beta"] - bnp["mean"] * scale
        y = y * scale[None, :, None, None] + shift[None, :, None, None]
        return jnp.maximum(y, 0.0)

    h = layer(x, params["conv1"], params["bn1"])
    return layer(h, params["conv2"], params["bn2"])


if __name__ == "__main__":
    key = jax.random.PRNGKey(0)
    kx, kp = jax.random.split(key)

    N, C_in, H, W = 2, 4, 16, 16
    C_out = 8
    x = jax.random.normal(kx, (N, C_in, H, W), dtype=jnp.float32)
    params = init_params(kp, C_in, C_out)

    fwd = jax.jit(double_conv_forward)
    out = jax.block_until_ready(fwd(x, params))

    ref = _reference(x, params)
    assert out.shape == (N, C_out, H, W), out.shape
    # bf16 matmul operands / bf16 intermediate activation => loosened tolerance.
    assert jnp.allclose(out, ref, atol=5e-2, rtol=5e-2), float(
        jnp.max(jnp.abs(out - ref)))

    print("KERNEL_OK")
</pallas_src>

<mosaic_0001>
module attributes {stable_mosaic.version = 11 : i64} {
  func.func @_conv3x3_bn_relu_kernel(%arg0: i32, %arg1: i32, %arg2: memref<1x4x384xbf16, #tpu.memory_space<vmem>>, %arg3: memref<1x4x384xbf16, #tpu.memory_space<vmem>>, %arg4: memref<9x8x4xbf16, #tpu.memory_space<vmem>>, %arg5: memref<8x1xf32, #tpu.memory_space<vmem>>, %arg6: memref<1x384xf32, #tpu.memory_space<vmem>>, %arg7: memref<1x8x384xbf16, #tpu.memory_space<vmem>>) attributes {dimension_semantics = [#tpu.dimension_semantics<parallel>, #tpu.dimension_semantics<parallel>], iteration_bounds = array<i64: 2, 2>, scalar_prefetch = 0 : i64, scratch_operands = 0 : i64, tpu.core_type = #tpu.core_type<tc>, window_params = [{transform_indices = @transform_0, window_bounds = array<i64: 1, 4, 384>}, {transform_indices = @transform_1, window_bounds = array<i64: 1, 4, 384>}, {pipeline_mode = #tpu.pipeline_mode<synchronous>, transform_indices = @transform_2, window_bounds = array<i64: 9, 8, 4>}, {pipeline_mode = #tpu.pipeline_mode<synchronous>, transform_indices = @transform_3, window_bounds = array<i64: 8, 1>}, {transform_indices = @transform_4, window_bounds = array<i64: 1, 384>}, {transform_indices = @transform_5, window_bounds = array<i64: 1, 8, 384>}]} {
    %c0 = arith.constant 0 : index
    %c0_0 = arith.constant 0 : index
    %c0_1 = arith.constant 0 : index
    %0 = vector.load %arg2[%c0, %c0_0, %c0_1] : memref<1x4x384xbf16, #tpu.memory_space<vmem>>, vector<1x4x384xbf16>
    %1 = vector.shape_cast %0 : vector<1x4x384xbf16> to vector<4x384xbf16>
    %c0_2 = arith.constant 0 : index
    %c0_3 = arith.constant 0 : index
    %c0_4 = arith.constant 0 : index
    %2 = vector.load %arg3[%c0_2, %c0_3, %c0_4] : memref<1x4x384xbf16, #tpu.memory_space<vmem>>, vector<1x4x384xbf16>
    %3 = vector.shape_cast %2 : vector<1x4x384xbf16> to vector<4x384xbf16>
    %4 = tpu.concatenate %1, %3 in 1 : vector<4x384xbf16>, vector<4x384xbf16> -> vector<4x768xbf16>
    %cst = arith.constant 0.000000e+00 : f32
    %5 = vector.broadcast %cst : f32 to vector<8x384xf32>
    %c0_5 = arith.constant 0 : index
    %c0_6 = arith.constant 0 : index
    %c0_7 = arith.constant 0 : index
    %6 = vector.load %arg4[%c0_5, %c0_6, %c0_7] : memref<9x8x4xbf16, #tpu.memory_space<vmem>>, vector<1x8x4xbf16>
    %7 = vector.shape_cast %6 : vector<1x8x4xbf16> to vector<8x4xbf16>
    %8 = vector.extract_strided_slice %4 {offsets = [0, 0], sizes = [4, 384], strides = [1, 1]} : vector<4x768xbf16> to vector<4x384xbf16>
    %cst_8 = arith.constant dense<0.000000e+00> : vector<8x384xf32>
    %9 = tpu.matmul %7, %8, %cst_8 {dimension_numbers = #tpu.dot_dimension_numbers<[1], [0], [0], [1], [0, 0, 1, 1], [], []>} : vector<8x4xbf16>, vector<4x384xbf16>, vector<8x384xf32> -> vector<8x384xf32>
    %10 = arith.addf %5, %9 : vector<8x384xf32>
    %c1 = arith.constant 1 : index
    %c0_9 = arith.constant 0 : index
    %c0_10 = arith.constant 0 : index
    %11 = vector.load %arg4[%c1, %c0_9, %c0_10] : memref<9x8x4xbf16, #tpu.memory_space<vmem>>, vector<1x8x4xbf16>
    %12 = vector.shape_cast %11 : vector<1x8x4xbf16> to vector<8x4xbf16>
    %13 = vector.extract_strided_slice %4 {offsets = [0, 1], sizes = [4, 384], strides = [1, 1]} : vector<4x768xbf16> to vector<4x384xbf16>
    %cst_11 = arith.constant dense<0.000000e+00> : vector<8x384xf32>
    %14 = tpu.matmul %12, %13, %cst_11 {dimension_numbers = #tpu.dot_dimension_numbers<[1], [0], [0], [1], [0, 0, 1, 1], [], []>} : vector<8x4xbf16>, vector<4x384xbf16>, vector<8x384xf32> -> vector<8x384xf32>
    %15 = arith.addf %10, %14 : vector<8x384xf32>
    %c2 = arith.constant 2 : index
    %c0_12 = arith.constant 0 : index
    %c0_13 = arith.constant 0 : index
    %16 = vector.load %arg4[%c2, %c0_12, %c0_13] : memref<9x8x4xbf16, #tpu.memory_space<vmem>>, vector<1x8x4xbf16>
    %17 = vector.shape_cast %16 : vector<1x8x4xbf16> to vector<8x4xbf16>
    %18 = vector.extract_strided_slice %4 {offsets = [0, 2], sizes = [4, 384], strides = [1, 1]} : vector<4x768xbf16> to vector<4x384xbf16>
    %cst_14 = arith.constant dense<0.000000e+00> : vector<8x384xf32>
    %19 = tpu.matmul %17, %18, %cst_14 {dimension_numbers = #tpu.dot_dimension_numbers<[1], [0], [0], [1], [0, 0, 1, 1], [], []>} : vector<8x4xbf16>, vector<4x384xbf16>, vector<8x384xf32> -> vector<8x384xf32>
    %20 = arith.addf %15, %19 : vector<8x384xf32>
    %c3 = arith.constant 3 : index
    %c0_15 = arith.constant 0 : index
    %c0_16 = arith.constant 0 : index
    %21 = vector.load %arg4[%c3, %c0_15, %c0_16] : memref<9x8x4xbf16, #tpu.memory_space<vmem>>, vector<1x8x4xbf16>
    %22 = vector.shape_cast %21 : vector<1x8x4xbf16> to vector<8x4xbf16>
    %23 = vector.extract_strided_slice %4 {offsets = [0, 18], sizes = [4, 384], strides = [1, 1]} : vector<4x768xbf16> to vector<4x384xbf16>
    %cst_17 = arith.constant dense<0.000000e+00> : vector<8x384xf32>
    %24 = tpu.matmul %22, %23, %cst_17 {dimension_numbers = #tpu.dot_dimension_numbers<[1], [0], [0], [1], [0, 0, 1, 1], [], []>} : vector<8x4xbf16>, vector<4x384xbf16>, vector<8x384xf32> -> vector<8x384xf32>
    %25 = arith.addf %20, %24 : vector<8x384xf32>
    %c4 = arith.constant 4 : index
    %c0_18 = arith.constant 0 : index
    %c0_19 = arith.constant 0 : index
    %26 = vector.load %arg4[%c4, %c0_18, %c0_19] : memref<9x8x4xbf16, #tpu.memory_space<vmem>>, vector<1x8x4xbf16>
    %27 = vector.shape_cast %26 : vector<1x8x4xbf16> to vector<8x4xbf16>
    %28 = vector.extract_strided_slice %4 {offsets = [0, 19], sizes = [4, 384], strides = [1, 1]} : vector<4x768xbf16> to vector<4x384xbf16>
    %cst_20 = arith.constant dense<0.000000e+00> : vector<8x384xf32>
    %29 = tpu.matmul %27, %28, %cst_20 {dimension_numbers = #tpu.dot_dimension_numbers<[1], [0], [0], [1], [0, 0, 1, 1], [], []>} : vector<8x4xbf16>, vector<4x384xbf16>, vector<8x384xf32> -> vector<8x384xf32>
    %30 = arith.addf %25, %29 : vector<8x384xf32>
    %c5 = arith.constant 5 : index
    %c0_21 = arith.constant 0 : index
    %c0_22 = arith.constant 0 : index
    %31 = vector.load %arg4[%c5, %c0_21, %c0_22] : memref<9x8x4xbf16, #tpu.memory_space<vmem>>, vector<1x8x4xbf16>
    %32 = vector.shape_cast %31 : vector<1x8x4xbf16> to vector<8x4xbf16>
    %33 = vector.extract_strided_slice %4 {offsets = [0, 20], sizes = [4, 384], strides = [1, 1]} : vector<4x768xbf16> to vector<4x384xbf16>
    %cst_23 = arith.constant dense<0.000000e+00> : vector<8x384xf32>
    %34 = tpu.matmul %32, %33, %cst_23 {dimension_numbers = #tpu.dot_dimension_numbers<[1], [0], [0], [1], [0, 0, 1, 1], [], []>} : vector<8x4xbf16>, vector<4x384xbf16>, vector<8x384xf32> -> vector<8x384xf32>
    %35 = arith.addf %30, %34 : vector<8x384xf32>
    %c6 = arith.constant 6 : index
    %c0_24 = arith.constant 0 : index
    %c0_25 = arith.constant 0 : index
    %36 = vector.load %arg4[%c6, %c0_24, %c0_25] : memref<9x8x4xbf16, #tpu.memory_space<vmem>>, vector<1x8x4xbf16>
    %37 = vector.shape_cast %36 : vector<1x8x4xbf16> to vector<8x4xbf16>
    %38 = vector.extract_strided_slice %4 {offsets = [0, 36], sizes = [4, 384], strides = [1, 1]} : vector<4x768xbf16> to vector<4x384xbf16>
    %cst_26 = arith.constant dense<0.000000e+00> : vector<8x384xf32>
    %39 = tpu.matmul %37, %38, %cst_26 {dimension_numbers = #tpu.dot_dimension_numbers<[1], [0], [0], [1], [0, 0, 1, 1], [], []>} : vector<8x4xbf16>, vector<4x384xbf16>, vector<8x384xf32> -> vector<8x384xf32>
    %40 = arith.addf %35, %39 : vector<8x384xf32>
    %c7 = arith.constant 7 : index
    %c0_27 = arith.constant 0 : index
    %c0_28 = arith.constant 0 : index
    %41 = vector.load %arg4[%c7, %c0_27, %c0_28] : memref<9x8x4xbf16, #tpu.memory_space<vmem>>, vector<1x8x4xbf16>
    %42 = vector.shape_cast %41 : vector<1x8x4xbf16> to vector<8x4xbf16>
    %43 = vector.extract_strided_slice %4 {offsets = [0, 37], sizes = [4, 384], strides = [1, 1]} : vector<4x768xbf16> to vector<4x384xbf16>
    %cst_29 = arith.constant dense<0.000000e+00> : vector<8x384xf32>
    %44 = tpu.matmul %42, %43, %cst_29 {dimension_numbers = #tpu.dot_dimension_numbers<[1], [0], [0], [1], [0, 0, 1, 1], [], []>} : vector<8x4xbf16>, vector<4x384xbf16>, vector<8x384xf32> -> vector<8x384xf32>
    %45 = arith.addf %40, %44 : vector<8x384xf32>
    %c8 = arith.constant 8 : index
    %c0_30 = arith.constant 0 : index
    %c0_31 = arith.constant 0 : index
    %46 = vector.load %arg4[%c8, %c0_30, %c0_31] : memref<9x8x4xbf16, #tpu.memory_space<vmem>>, vector<1x8x4xbf16>
    %47 = vector.shape_cast %46 : vector<1x8x4xbf16> to vector<8x4xbf16>
    %48 = vector.extract_strided_slice %4 {offsets = [0, 38], sizes = [4, 384], strides = [1, 1]} : vector<4x768xbf16> to vector<4x384xbf16>
    %cst_32 = arith.constant dense<0.000000e+00> : vector<8x384xf32>
    %49 = tpu.matmul %47, %48, %cst_32 {dimension_numbers = #tpu.dot_dimension_numbers<[1], [0], [0], [1], [0, 0, 1, 1], [], []>} : vector<8x4xbf16>, vector<4x384xbf16>, vector<8x384xf32> -> vector<8x384xf32>
    %50 = arith.addf %45, %49 : vector<8x384xf32>
    %c0_33 = arith.constant 0 : index
    %c0_34 = arith.constant 0 : index
    %51 = vector.load %arg5[%c0_33, %c0_34] : memref<8x1xf32, #tpu.memory_space<vmem>>, vector<8x1xf32>
    %52 = vector.broadcast %51 : vector<8x1xf32> to vector<8x384xf32>
    %53 = arith.addf %50, %52 : vector<8x384xf32>
    %cst_35 = arith.constant 0.000000e+00 : f32
    %54 = vector.broadcast %cst_35 : f32 to vector<8x384xf32>
    %55 = arith.maximumf %53, %54 : vector<8x384xf32>
    %c0_36 = arith.constant 0 : index
    %c0_37 = arith.constant 0 : index
    %56 = vector.load %arg6[%c0_36, %c0_37] : memref<1x384xf32, #tpu.memory_space<vmem>>, vector<1x384xf32>
    %57 = vector.broadcast %56 : vector<1x384xf32> to vector<8x384xf32>
    %58 = arith.mulf %55, %57 : vector<8x384xf32>
    %59 = arith.truncf %58 : vector<8x384xf32> to vector<8x384xbf16>
    %c0_38 = arith.constant 0 : index
    %c0_39 = arith.constant 0 : index
    %c0_40 = arith.constant 0 : index
    %60 = vector.load %arg7[%c0_38, %c0_39, %c0_40] : memref<1x8x384xbf16, #tpu.memory_space<vmem>>, vector<1x8x384xbf16>
    %61 = vector.shape_cast %60 : vector<1x8x384xbf16> to vector<8x384xbf16>
    %62 = vector.shape_cast %59 : vector<8x384xbf16> to vector<1x8x384xbf16>
    tpu.vector_store %arg7[%c0_38, %c0_39, %c0_40], %62 {strides = array<i32>} : memref<1x8x384xbf16, #tpu.memory_space<vmem>>, vector<1x8x384xbf16>,
    return
  }
  func.func @transform_0(%arg0: i32, %arg1: i32) -> (i32, i32, i32) {
    %c0_i32 = arith.constant 0 : i32
    %c0_i32_0 = arith.constant 0 : i32
    return %arg0, %c0_i32, %arg1 : i32, i32, i32
  }
  func.func @transform_1(%arg0: i32, %arg1: i32) -> (i32, i32, i32) {
    %c1_i32 = arith.constant 1 : i32
    %0 = arith.addi %arg1, %c1_i32 : i32
    %c0_i32 = arith.constant 0 : i32
    %c0_i32_0 = arith.constant 0 : i32
    return %arg0, %c0_i32, %0 : i32, i32, i32
  }
  func.func @transform_2(%arg0: i32, %arg1: i32) -> (i32, i32, i32) {
    %c0_i32 = arith.constant 0 : i32
    %c0_i32_0 = arith.constant 0 : i32
    %c0_i32_1 = arith.constant 0 : i32
    %c0_i32_2 = arith.constant 0 : i32
    return %c0_i32, %c0_i32_0, %c0_i32_1 : i32, i32, i32
  }
  func.func @transform_3(%arg0: i32, %arg1: i32) -> (i32, i32) {
    %c0_i32 = arith.constant 0 : i32
    %c0_i32_0 = arith.constant 0 : i32
    %c0_i32_1 = arith.constant 0 : i32
    return %c0_i32, %c0_i32_0 : i32, i32
  }
  func.func @transform_4(%arg0: i32, %arg1: i32) -> (i32, i32) {
    %c0_i32 = arith.constant 0 : i32
    %c0_i32_0 = arith.constant 0 : i32
    return %c0_i32, %arg1 : i32, i32
  }
  func.func @transform_5(%arg0: i32, %arg1: i32) -> (i32, i32, i32) {
    %c0_i32 = arith.constant 0 : i32
    %c0_i32_0 = arith.constant 0 : i32
    return %arg0, %c0_i32, %arg1 : i32, i32, i32
  }
}

module attributes {stable_mosaic.version = 11 : i64} {
  func.func @_conv3x3_bn_relu_kernel(%arg0: i32, %arg1: i32, %arg2: memref<1x8x384xbf16, #tpu.memory_space<vmem>>, %arg3: memref<1x8x384xbf16, #tpu.memory_space<vmem>>, %arg4: memref<9x8x8xbf16, #tpu.memory_space<vmem>>, %arg5: memref<8x1xf32, #tpu.memory_space<vmem>>, %arg6: memref<1x384xf32, #tpu.memory_space<vmem>>, %arg7: memref<1x8x384xf32, #tpu.memory_space<vmem>>) attributes {dimension_semantics = [#tpu.dimension_semantics<parallel>, #tpu.dimension_semantics<parallel>], iteration_bounds = array<i64: 2, 1>, scalar_prefetch = 0 : i64, scratch_operands = 0 : i64, tpu.core_type = #tpu.core_type<tc>, window_params = [{transform_indices = @transform_0, window_bounds = array<i64: 1, 8, 384>}, {transform_indices = @transform_1, window_bounds = array<i64: 1, 8, 384>}, {pipeline_mode = #tpu.pipeline_mode<synchronous>, transform_indices = @transform_2, window_bounds = array<i64: 9, 8, 8>}, {pipeline_mode = #tpu.pipeline_mode<synchronous>, transform_indices = @transform_3, window_bounds = array<i64: 8, 1>}, {transform_indices = @transform_4, window_bounds = array<i64: 1, 384>}, {transform_indices = @transform_5, window_bounds = array<i64: 1, 8, 384>}]} {
    %c0 = arith.constant 0 : index
    %c0_0 = arith.constant 0 : index
    %c0_1 = arith.constant 0 : index
    %0 = vector.load %arg2[%c0, %c0_0, %c0_1] : memref<1x8x384xbf16, #tpu.memory_space<vmem>>, vector<1x8x384xbf16>
    %1 = vector.shape_cast %0 : vector<1x8x384xbf16> to vector<8x384xbf16>
    %c0_2 = arith.constant 0 : index
    %c0_3 = arith.constant 0 : index
    %c0_4 = arith.constant 0 : index
    %2 = vector.load %arg3[%c0_2, %c0_3, %c0_4] : memref<1x8x384xbf16, #tpu.memory_space<vmem>>, vector<1x8x384xbf16>
    %3 = vector.shape_cast %2 : vector<1x8x384xbf16> to vector<8x384xbf16>
    %4 = tpu.concatenate %1, %3 in 1 : vector<8x384xbf16>, vector<8x384xbf16> -> vector<8x768xbf16>
    %cst = arith.constant 0.000000e+00 : f32
    %5 = vector.broadcast %cst : f32 to vector<8x384xf32>
    %c0_5 = arith.constant 0 : index
    %c0_6 = arith.constant 0 : index
    %c0_7 = arith.constant 0 : index
    %6 = vector.load %arg4[%c0_5, %c0_6, %c0_7] : memref<9x8x8xbf16, #tpu.memory_space<vmem>>, vector<1x8x8xbf16>
    %7 = vector.shape_cast %6 : vector<1x8x8xbf16> to vector<8x8xbf16>
    %8 = vector.extract_strided_slice %4 {offsets = [0, 0], sizes = [8, 384], strides = [1, 1]} : vector<8x768xbf16> to vector<8x384xbf16>
    %cst_8 = arith.constant dense<0.000000e+00> : vector<8x384xf32>
    %9 = tpu.matmul %7, %8, %cst_8 {dimension_numbers = #tpu.dot_dimension_numbers<[1], [0], [0], [1], [0, 0, 1, 1], [], []>} : vector<8x8xbf16>, vector<8x384xbf16>, vector<8x384xf32> -> vector<8x384xf32>
    %10 = arith.addf %5, %9 : vector<8x384xf32>
    %c1 = arith.constant 1 : index
    %c0_9 = arith.constant 0 : index
    %c0_10 = arith.constant 0 : index
    %11 = vector.load %arg4[%c1, %c0_9, %c0_10] : memref<9x8x8xbf16, #tpu.memory_space<vmem>>, vector<1x8x8xbf16>
    %12 = vector.shape_cast %11 : vector<1x8x8xbf16> to vector<8x8xbf16>
    %13 = vector.extract_strided_slice %4 {offsets = [0, 1], sizes = [8, 384], strides = [1, 1]} : vector<8x768xbf16> to vector<8x384xbf16>
    %cst_11 = arith.constant dense<0.000000e+00> : vector<8x384xf32>
    %14 = tpu.matmul %12, %13, %cst_11 {dimension_numbers = #tpu.dot_dimension_numbers<[1], [0], [0], [1], [0, 0, 1, 1], [], []>} : vector<8x8xbf16>, vector<8x384xbf16>, vector<8x384xf32> -> vector<8x384xf32>
    %15 = arith.addf %10, %14 : vector<8x384xf32>
    %c2 = arith.constant 2 : index
    %c0_12 = arith.constant 0 : index
    %c0_13 = arith.constant 0 : index
    %16 = vector.load %arg4[%c2, %c0_12, %c0_13] : memref<9x8x8xbf16, #tpu.memory_space<vmem>>, vector<1x8x8xbf16>
    %17 = vector.shape_cast %16 : vector<1x8x8xbf16> to vector<8x8xbf16>
    %18 = vector.extract_strided_slice %4 {offsets = [0, 2], sizes = [8, 384], strides = [1, 1]} : vector<8x768xbf16> to vector<8x384xbf16>
    %cst_14 = arith.constant dense<0.000000e+00> : vector<8x384xf32>
    %19 = tpu.matmul %17, %18, %cst_14 {dimension_numbers = #tpu.dot_dimension_numbers<[1], [0], [0], [1], [0, 0, 1, 1], [], []>} : vector<8x8xbf16>, vector<8x384xbf16>, vector<8x384xf32> -> vector<8x384xf32>
    %20 = arith.addf %15, %19 : vector<8x384xf32>
    %c3 = arith.constant 3 : index
    %c0_15 = arith.constant 0 : index
    %c0_16 = arith.constant 0 : index
    %21 = vector.load %arg4[%c3, %c0_15, %c0_16] : memref<9x8x8xbf16, #tpu.memory_space<vmem>>, vector<1x8x8xbf16>
    %22 = vector.shape_cast %21 : vector<1x8x8xbf16> to vector<8x8xbf16>
    %23 = vector.extract_strided_slice %4 {offsets = [0, 18], sizes = [8, 384], strides = [1, 1]} : vector<8x768xbf16> to vector<8x384xbf16>
    %cst_17 = arith.constant dense<0.000000e+00> : vector<8x384xf32>
    %24 = tpu.matmul %22, %23, %cst_17 {dimension_numbers = #tpu.dot_dimension_numbers<[1], [0], [0], [1], [0, 0, 1, 1], [], []>} : vector<8x8xbf16>, vector<8x384xbf16>, vector<8x384xf32> -> vector<8x384xf32>
    %25 = arith.addf %20, %24 : vector<8x384xf32>
    %c4 = arith.constant 4 : index
    %c0_18 = arith.constant 0 : index
    %c0_19 = arith.constant 0 : index
    %26 = vector.load %arg4[%c4, %c0_18, %c0_19] : memref<9x8x8xbf16, #tpu.memory_space<vmem>>, vector<1x8x8xbf16>
    %27 = vector.shape_cast %26 : vector<1x8x8xbf16> to vector<8x8xbf16>
    %28 = vector.extract_strided_slice %4 {offsets = [0, 19], sizes = [8, 384], strides = [1, 1]} : vector<8x768xbf16> to vector<8x384xbf16>
    %cst_20 = arith.constant dense<0.000000e+00> : vector<8x384xf32>
    %29 = tpu.matmul %27, %28, %cst_20 {dimension_numbers = #tpu.dot_dimension_numbers<[1], [0], [0], [1], [0, 0, 1, 1], [], []>} : vector<8x8xbf16>, vector<8x384xbf16>, vector<8x384xf32> -> vector<8x384xf32>
    %30 = arith.addf %25, %29 : vector<8x384xf32>
    %c5 = arith.constant 5 : index
    %c0_21 = arith.constant 0 : index
    %c0_22 = arith.constant 0 : index
    %31 = vector.load %arg4[%c5, %c0_21, %c0_22] : memref<9x8x8xbf16, #tpu.memory_space<vmem>>, vector<1x8x8xbf16>
    %32 = vector.shape_cast %31 : vector<1x8x8xbf16> to vector<8x8xbf16>
    %33 = vector.extract_strided_slice %4 {offsets = [0, 20], sizes = [8, 384], strides = [1, 1]} : vector<8x768xbf16> to vector<8x384xbf16>
    %cst_23 = arith.constant dense<0.000000e+00> : vector<8x384xf32>
    %34 = tpu.matmul %32, %33, %cst_23 {dimension_numbers = #tpu.dot_dimension_numbers<[1], [0], [0], [1], [0, 0, 1, 1], [], []>} : vector<8x8xbf16>, vector<8x384xbf16>, vector<8x384xf32> -> vector<8x384xf32>
    %35 = arith.addf %30, %34 : vector<8x384xf32>
    %c6 = arith.constant 6 : index
    %c0_24 = arith.constant 0 : index
    %c0_25 = arith.constant 0 : index
    %36 = vector.load %arg4[%c6, %c0_24, %c0_25] : memref<9x8x8xbf16, #tpu.memory_space<vmem>>, vector<1x8x8xbf16>
    %37 = vector.shape_cast %36 : vector<1x8x8xbf16> to vector<8x8xbf16>
    %38 = vector.extract_strided_slice %4 {offsets = [0, 36], sizes = [8, 384], strides = [1, 1]} : vector<8x768xbf16> to vector<8x384xbf16>
    %cst_26 = arith.constant dense<0.000000e+00> : vector<8x384xf32>
    %39 = tpu.matmul %37, %38, %cst_26 {dimension_numbers = #tpu.dot_dimension_numbers<[1], [0], [0], [1], [0, 0, 1, 1], [], []>} : vector<8x8xbf16>, vector<8x384xbf16>, vector<8x384xf32> -> vector<8x384xf32>
    %40 = arith.addf %35, %39 : vector<8x384xf32>
    %c7 = arith.constant 7 : index
    %c0_27 = arith.constant 0 : index
    %c0_28 = arith.constant 0 : index
    %41 = vector.load %arg4[%c7, %c0_27, %c0_28] : memref<9x8x8xbf16, #tpu.memory_space<vmem>>, vector<1x8x8xbf16>
    %42 = vector.shape_cast %41 : vector<1x8x8xbf16> to vector<8x8xbf16>
    %43 = vector.extract_strided_slice %4 {offsets = [0, 37], sizes = [8, 384], strides = [1, 1]} : vector<8x768xbf16> to vector<8x384xbf16>
    %cst_29 = arith.constant dense<0.000000e+00> : vector<8x384xf32>
    %44 = tpu.matmul %42, %43, %cst_29 {dimension_numbers = #tpu.dot_dimension_numbers<[1], [0], [0], [1], [0, 0, 1, 1], [], []>} : vector<8x8xbf16>, vector<8x384xbf16>, vector<8x384xf32> -> vector<8x384xf32>
    %45 = arith.addf %40, %44 : vector<8x384xf32>
    %c8 = arith.constant 8 : index
    %c0_30 = arith.constant 0 : index
    %c0_31 = arith.constant 0 : index
    %46 = vector.load %arg4[%c8, %c0_30, %c0_31] : memref<9x8x8xbf16, #tpu.memory_space<vmem>>, vector<1x8x8xbf16>
    %47 = vector.shape_cast %46 : vector<1x8x8xbf16> to vector<8x8xbf16>
    %48 = vector.extract_strided_slice %4 {offsets = [0, 38], sizes = [8, 384], strides = [1, 1]} : vector<8x768xbf16> to vector<8x384xbf16>
    %cst_32 = arith.constant dense<0.000000e+00> : vector<8x384xf32>
    %49 = tpu.matmul %47, %48, %cst_32 {dimension_numbers = #tpu.dot_dimension_numbers<[1], [0], [0], [1], [0, 0, 1, 1], [], []>} : vector<8x8xbf16>, vector<8x384xbf16>, vector<8x384xf32> -> vector<8x384xf32>
    %50 = arith.addf %45, %49 : vector<8x384xf32>
    %c0_33 = arith.constant 0 : index
    %c0_34 = arith.constant 0 : index
    %51 = vector.load %arg5[%c0_33, %c0_34] : memref<8x1xf32, #tpu.memory_space<vmem>>, vector<8x1xf32>
    %52 = vector.broadcast %51 : vector<8x1xf32> to vector<8x384xf32>
    %53 = arith.addf %50, %52 : vector<8x384xf32>
    %cst_35 = arith.constant 0.000000e+00 : f32
    %54 = vector.broadcast %cst_35 : f32 to vector<8x384xf32>
    %55 = arith.maximumf %53, %54 : vector<8x384xf32>
    %c0_36 = arith.constant 0 : index
    %c0_37 = arith.constant 0 : index
    %56 = vector.load %arg6[%c0_36, %c0_37] : memref<1x384xf32, #tpu.memory_space<vmem>>, vector<1x384xf32>
    %57 = vector.broadcast %56 : vector<1x384xf32> to vector<8x384xf32>
    %58 = arith.mulf %55, %57 : vector<8x384xf32>
    %c0_38 = arith.constant 0 : index
    %c0_39 = arith.constant 0 : index
    %c0_40 = arith.constant 0 : index
    %59 = vector.load %arg7[%c0_38, %c0_39, %c0_40] : memref<1x8x384xf32, #tpu.memory_space<vmem>>, vector<1x8x384xf32>
    %60 = vector.shape_cast %59 : vector<1x8x384xf32> to vector<8x384xf32>
    %61 = vector.shape_cast %58 : vector<8x384xf32> to vector<1x8x384xf32>
    tpu.vector_store %arg7[%c0_38, %c0_39, %c0_40], %61 {strides = array<i32>} : memref<1x8x384xf32, #tpu.memory_space<vmem>>, vector<1x8x384xf32>,
    return
  }
  func.func @transform_0(%arg0: i32, %arg1: i32) -> (i32, i32, i32) {
    %c0_i32 = arith.constant 0 : i32
    %c0_i32_0 = arith.constant 0 : i32
    return %arg0, %c0_i32, %arg1 : i32, i32, i32
  }
  func.func @transform_1(%arg0: i32, %arg1: i32) -> (i32, i32, i32) {
    %c1_i32 = arith.constant 1 : i32
    %0 = arith.addi %arg1, %c1_i32 : i32
    %c0_i32 = arith.constant 0 : i32
    %c0_i32_0 = arith.constant 0 : i32
    return %arg0, %c0_i32, %0 : i32, i32, i32
  }
  func.func @transform_2(%arg0: i32, %arg1: i32) -> (i32, i32, i32) {
    %c0_i32 = arith.constant 0 : i32
    %c0_i32_0 = arith.constant 0 : i32
    %c0_i32_1 = arith.constant 0 : i32
    %c0_i32_2 = arith.constant 0 : i32
    return %c0_i32, %c0_i32_0, %c0_i32_1 : i32, i32, i32
  }
  func.func @transform_3(%arg0: i32, %arg1: i32) -> (i32, i32) {
    %c0_i32 = arith.constant 0 : i32
    %c0_i32_0 = arith.constant 0 : i32
    %c0_i32_1 = arith.constant 0 : i32
    return %c0_i32, %c0_i32_0 : i32, i32
  }
  func.func @transform_4(%arg0: i32, %arg1: i32) -> (i32, i32) {
    %c0_i32 = arith.constant 0 : i32
    %c0_i32_0 = arith.constant 0 : i32
    return %c0_i32, %arg1 : i32, i32
  }
  func.func @transform_5(%arg0: i32, %arg1: i32) -> (i32, i32, i32) {
    %c0_i32 = arith.constant 0 : i32
    %c0_i32_0 = arith.constant 0 : i32
    return %arg0, %c0_i32, %arg1 : i32, i32, i32
  }
}

</mosaic_0001>

<bundles_post_ra>
// kernel: double_conv_forward.3
= control target key start
LH: loop header
LB: loop body
LE: loop exit
PB: predicated region body
PF: predicated region fallthrough
CT: control target
= control target key end

     0   :  { %s1698_s18 = smov 0   ;;  %s1700_s19 = smov 0   ;;  %s1876_s0 = inlined_call_operand.vmem [shape: bf16[2,8,768], index: 0, kind: input, shape index: {}, may-alias: {0,1}]   ;;  %s1877_s1 = inlined_call_operand.vmem [shape: bf16[2,8,768], index: 1, kind: input, shape index: {}, may-alias: {0,1}]   ;;  %s1878_s2 = inlined_call_operand.vmem [shape: bf16[9,8,8], index: 2, kind: input, shape index: {}]   ;;  %s1879_s3 = inlined_call_operand.vmem [shape: f32[8,1], index: 3, kind: input, shape index: {}]   ;;  %s1880_s4 = inlined_call_operand.vmem [shape: f32[1,384], index: 4, kind: input, shape index: {}]   ;;  %s1881_s5 = inlined_call_operand.vmem [shape: f32[2,8,384], index: 5, kind: output, shape index: {}]  }
   0x1   :  { %s1702_s20 = smov 0  }
   0x2 LB: > { %s27_s21 = sadd.s32 1, %s1651_s19  ;;  %p1471_p0 = scmp.ge.s32.totalorder %s1655_s20, 1  ;;  %s1655_s20 = sphi %s1702_s20, %s15_s20   ;;  %s1651_s19 = sphi %s1700_s19, %s1883_s19   ;;  %s1647_s18 = sphi %s1698_s18, %s1882_s18  }
   0x3   : > { %p29_p1 = scmp.ge.s32.totalorder %s27_s21, 2  ;;  %p239_p2 = scmp.lt.s32.totalorder %s1655_s20, 3 }
   0x5   : > { %s1885_s21 = smov (%p29_p1, %s27_s21), 0  ;;  %p240_p3 = pnand %p1471_p0, %p239_p2 }
   0x6   : > { %p290_p4 = scmp.lt.s32.totalorder (!%p240_p3), %s1647_s18, 1  ;;  %v1657_v0 = vmov (!%p240_p3), 0.0   ;;  %v1658_v1 = vmov (!%p240_p3), 0   ;;  %vm1659_vm0 = vmmov (!%p240_p3), 0   ;;  %s1660_s30 = smov (!%p240_p3), 127   ;;  %v1314_v7 = vld [vmem:[%s1879_s3] sm:$0xff] (!%p240_p3) }
   0x7   : > { %243 = sbr.rel (%p240_p3) target bundleno = 431 (0x1af), region = 40  ;;  %1536 = vmatprep.subr.bf16.mxu1 (!%p240_p3), %v1657_v0  ;;  %402 = vmatprep.mubr.bf16.mxu0 (!%p240_p3), %v1658_v1  ;;  %s1661_s6 = smov (!%p240_p3), 126   ;;  %vm352_vm1 = vcmask (!%p240_p3), 1039360   ;;  %vm360_vm2 = vcmask (!%p240_p3), 1043456   ;;  %v1479_v17 = vld [vmem:[%s1878_s2 + $0x4] sm:$0xf] (!%p240_p3) }
   0x8   : > { %1538 = vmatprep.mubr.msk.bf16.mxu1 (!%p240_p3), %vm1659_vm0, %v1657_v0  ;;  %1628 = vset.pattern.permute.xlu0 (!%p240_p3), %v1658_v1  ;;  %s1662_s7 = smov (!%p240_p3), 110   ;;  %s1663_s8 = smov (!%p240_p3), 109   ;;  %vm356_vm3 = vcmask (!%p240_p3), 64512   ;;  %vm554_vm4 = vcmask (!%p240_p3), 1031168   ;;  %v341_v27 = vld [vmem:[%s1878_s2] sm:$0xf] (!%p240_p3) }
   0x9   : > { %s1664_s9 = smov (!%p240_p3), 108   ;;  %s1665_s10 = smov (!%p240_p3), 92   ;;  %vm664_vm5 = vcmask (!%p240_p3), 900096   ;;  %v1486_v37 = vld [vmem:[%s1878_s2 + $0x8] sm:$0xf] (!%p240_p3)  ;;  %vm774_vm6 = vcmask (!%p240_p3), 891904  }
   0xa   : > { %s1666_s11 = smov (!%p240_p3), 91   ;;  %s1667_s12 = smov (!%p240_p3), 90   ;;  %v1490_v47 = vld [vmem:[%s1878_s2 + $0xc] sm:$0xf] (!%p240_p3)  ;;  %vm884_vm7 = vcmask (!%p240_p3), 883712   ;;  %vm994_vm8 = vcmask (!%p240_p3), 752640  }
   0xb   : > { %v1494_v57 = vld [vmem:[%s1878_s2 + $0x10] sm:$0xf] (!%p240_p3)  ;;  %vm1104_vm9 = vcmask (!%p240_p3), 744448   ;;  %vm1214_vm10 = vcmask (!%p240_p3), 736256  }
   0xe   : > { %s1887_s18 = smov (!%p290_p4, %s1647_s18), 1 }
   0xf   : > { %s1717_s22 = smul.u32 24, %s1887_s18 }
  0x11   : > { %s297_s25 = scalar_lea.vmem %s1876_s0, %s1717_s22  ;;  %s1517_s26 = sadd.s32 12, %s1717_s22 }
  0x12   : > { %v1728_v2 = vld [vmem:[%s297_s25 + $0x8] ss:$0 sps:$4 sm:$0xff]   ;;  %v327_v3 = vld [vmem:[%s297_s25] sm:$0xff]  ;;  %s308_s29 = scalar_lea.vmem %s1877_s1, %s1517_s26  ;;  %s324_s16 = scalar_lea.vmem %s1881_s5, %s1717_s22 }
  0x13   : > { %v1733_v4 = vcombine.low %v327_v3, %v327_v3  ;;  %348 = vrot.lane.b32.xlu1 %v1728_v2, %s1660_s30  ;;  %v1631_v5 = vld [vmem:[%s308_s29] ss:$0 sps:$4 sm:$0xff]   ;;  %v1476_v6 = vcombine.high %v327_v3, %v327_v3  ;;  %v461_v18 = vsel %vm360_vm2, %v1728_v2, 0 }
  0x15   : > { %344 = vrot.lane.b32.xlu0 %v1733_v4, %s1660_s30  ;;  %v455_v21 = vsel %vm360_vm2, %v1733_v4, 0 }
  0x17   : > { %350 = vrot.lane.b32.xlu1 %v1631_v5, %s1660_s30 }
  0x19   : > { %346 = vrot.lane.b32.xlu0 %v1476_v6, %s1660_s30 }
  0x1b   : > { %548 = vrot.lane.b32.xlu1 %v1476_v6, %s1661_s6 }
  0x1d   : > { %546 = vrot.lane.b32.xlu0 %v1733_v4, %s1661_s6 }
  0x1f   : > { %552 = vrot.lane.b32.xlu1 %v1631_v5, %s1661_s6 }
  0x21   : > { %550 = vrot.lane.b32.xlu0 %v1728_v2, %s1661_s6 }
  0x23   : > { %658 = vrot.lane.b32.xlu1 %v1476_v6, %s1662_s7 }
  0x25   : > { %656 = vrot.lane.b32.xlu0 %v1733_v4, %s1662_s7 }
  0x27   : > { %662 = vrot.lane.b32.xlu1 %v1631_v5, %s1662_s7 }
  0x29   : > { %660 = vrot.lane.b32.xlu0 %v1728_v2, %s1662_s7 }
  0x2b   : > { %768 = vrot.lane.b32.xlu1 %v1476_v6, %s1663_s8 }
  0x2d   : > { %766 = vrot.lane.b32.xlu0 %v1733_v4, %s1663_s8 }
  0x2f   : > { %772 = vrot.lane.b32.xlu1 %v1631_v5, %s1663_s8 }
  0x31   : > { %770 = vrot.lane.b32.xlu0 %v1728_v2, %s1663_s8 }
  0x33   : > { %878 = vrot.lane.b32.xlu1 %v1476_v6, %s1664_s9 }
  0x35   : > { %876 = vrot.lane.b32.xlu0 %v1733_v4, %s1664_s9 }
  0x37   : > { %882 = vrot.lane.b32.xlu1 %v1631_v5, %s1664_s9 }
  0x39   : > { %880 = vrot.lane.b32.xlu0 %v1728_v2, %s1664_s9 }
  0x3b   : > { %988 = vrot.lane.b32.xlu1 %v1476_v6, %s1665_s10 }
  0x3d   : > { %986 = vrot.lane.b32.xlu0 %v1733_v4, %s1665_s10 }
  0x3f   : > { %992 = vrot.lane.b32.xlu1 %v1631_v5, %s1665_s10 }
  0x41   : > { %990 = vrot.lane.b32.xlu0 %v1728_v2, %s1665_s10 }
  0x43   : > { %1098 = vrot.lane.b32.xlu1 %v1476_v6, %s1666_s11 }
  0x45   : > { %1096 = vrot.lane.b32.xlu0 %v1733_v4, %s1666_s11 }
  0x47   : > { %1102 = vrot.lane.b32.xlu1 %v1631_v5, %s1666_s11 }
  0x49   : > { %1100 = vrot.lane.b32.xlu0 %v1728_v2, %s1666_s11 }
  0x4b   : > { %1208 = vrot.lane.b32.xlu1 %v1476_v6, %s1667_s12 }
  0x4d   : > { %1206 = vrot.lane.b32.xlu0 %v1733_v4, %s1667_s12 }
  0x4f   : > { %1212 = vrot.lane.b32.xlu1 %v1631_v5, %s1667_s12  ;;  %v1498_v5 = vld [vmem:[%s1878_s2 + $0x14] sm:$0xf] }
  0x51   : > { %1210 = vrot.lane.b32.xlu0 %v1728_v2, %s1667_s12 }
  0x55   : > { %1317 = vperm.xlu0 %1628, %v1314_v7  }
  0x85   : > { %v349_v8 = vpop.permute.xlu1 %348 }
  0x87   : > { %v345_v9 = vpop.permute.xlu0 %344 }
  0x89   : > { %v351_v10 = vpop.permute.xlu1 %350 }
  0x8a   : > { %v355_v12 = vsel %vm352_vm1, %v349_v8, %v351_v10 }
  0x8b   : > { %v347_v11 = vpop.permute.xlu0 %346  ;;  %v368_v15 = vsel %vm360_vm2, %v355_v12, 0 }
  0x8c   : > { %v354_v13 = vsel %vm352_vm1, %v347_v11, %v349_v8  ;;  %v353_v14 = vsel %vm352_vm1, %v345_v9, %v347_v11  ;;  %1537 = vmatpush3.bf16.msra.mxu1 %v368_v15  ;;  %v1502_v15 = vld [vmem:[%s1878_s2 + $0x18] sm:$0xf] }
  0x8d   : > { %1480 = vmatprep.subr.msk.bf16.mxu0 %vm360_vm2, %v354_v13  ;;  %v362_v16 = vsel %vm360_vm2, %v353_v14, 0  ;;  %1542 = vmatprep.subr.bf16.mxu1 %v1657_v0  ;;  %v549_v19 = vpop.permute.xlu1 %548 }
  0x8e   : > { %371 = vmatpush1.bf16.msra.mxu0 %v362_v16 }
  0x8f   : > { %v547_v20 = vpop.permute.xlu0 %546  ;;  %1483 = vmatprep.subr.msk.bf16.mxu0 %vm360_vm2, %v1476_v6  ;;  %1539 = vmatmul.mubr.msk.bf16.vlgmr.msra.gmra.mrb[0].mxu1 %vm356_vm3, %v1479_v17 }
  0x90   : > { %1543 = vmatpush3.bf16.msra.mxu1 %v461_v18  ;;  %1544 = vmatprep.mubr.msk.bf16.mxu1 %vm1659_vm0, %v1657_v0  ;;  %v555_v24 = vsel %vm554_vm4, %v547_v20, %v549_v19 }
  0x91   : > { %1481 = vmatmul.mubr.msk.bf16.vlgmr.msra.gmra.mrb[0].mxu0 %vm356_vm3, %v1479_v17  ;;  %v553_v22 = vpop.permute.xlu1 %552  ;;  %1548 = vmatprep.subr.bf16.mxu1 %v1657_v0  ;;  %v562_v30 = vsel %vm360_vm2, %v555_v24, 0 }
  0x92   : > { %464 = vmatpush1.bf16.msra.mxu0 %v455_v21  ;;  %495 = vmatprep.mubr.bf16.mxu0 %v1658_v1 }
  0x93   : > { %v551_v23 = vpop.permute.xlu0 %550 }
  0x94   : > { %v556_v25 = vsel %vm554_vm4, %v549_v19, %v551_v23  ;;  %v557_v26 = vsel %vm554_vm4, %v551_v23, %v553_v22 }
  0x95   : > { %1487 = vmatprep.subr.msk.bf16.mxu0 %vm360_vm2, %v556_v25  ;;  %v568_v28 = vsel %vm360_vm2, %v557_v26, 0  ;;  %v659_v29 = vpop.permute.xlu1 %658  ;;  %v1506_v25 = vld [vmem:[%s1878_s2 + $0x1c] sm:$0xf] }
  0x97   : > { %v657_v31 = vpop.permute.xlu0 %656  ;;  %1545 = vmatmul.mubr.msk.bf16.vlgmr.msra.gmra.mrb[4].mxu1 %vm356_vm3, %v341_v27 }
  0x98   : > { %1549 = vmatpush3.bf16.msra.mxu1 %v568_v28  ;;  %1550 = vmatprep.mubr.msk.bf16.mxu1 %vm1659_vm0, %v1657_v0  ;;  %v665_v34 = vsel %vm664_vm5, %v657_v31, %v659_v29  ;;  %v1510_v28 = vld [vmem:[%s1878_s2 + $0x20] sm:$0xf] }
  0x99   : > { %1484 = vmatmul.mubr.msk.bf16.vlgmr.msra.gmra.mrb[4].mxu0 %vm356_vm3, %v341_v27  ;;  %v663_v32 = vpop.permute.xlu1 %662  ;;  %1554 = vmatprep.subr.bf16.mxu1 %v1657_v0  ;;  %v672_v40 = vsel %vm360_vm2, %v665_v34, 0 }
  0x9a   : > { %571 = vmatpush1.bf16.msra.mxu0 %v562_v30  ;;  %602 = vmatprep.mubr.bf16.mxu0 %v1658_v1 }
  0x9b   : > { %v661_v33 = vpop.permute.xlu0 %660 }
  0x9c   : > { %v666_v35 = vsel %vm664_vm5, %v659_v29, %v661_v33  ;;  %v667_v36 = vsel %vm664_vm5, %v661_v33, %v663_v32 }
  0x9d   : > { %1491 = vmatprep.subr.msk.bf16.mxu0 %vm360_vm2, %v666_v35  ;;  %v678_v38 = vsel %vm360_vm2, %v667_v36, 0  ;;  %v769_v39 = vpop.permute.xlu1 %768 }
  0x9f   : > { %v767_v41 = vpop.permute.xlu0 %766  ;;  %1551 = vmatmul.mubr.msk.bf16.vlgmr.msra.gmra.mrb[8].mxu1 %vm356_vm3, %v1486_v37 }
  0xa0   : > { %1555 = vmatpush3.bf16.msra.mxu1 %v678_v38  ;;  %1556 = vmatprep.mubr.msk.bf16.mxu1 %vm1659_vm0, %v1657_v0  ;;  %v775_v44 = vsel %vm774_vm6, %v767_v41, %v769_v39 }
  0xa1   : > { %1488 = vmatmul.mubr.msk.bf16.vlgmr.msra.gmra.mrb[8].mxu0 %vm356_vm3, %v1486_v37  ;;  %v773_v42 = vpop.permute.xlu1 %772  ;;  %1560 = vmatprep.subr.bf16.mxu1 %v1657_v0  ;;  %v782_v50 = vsel %vm360_vm2, %v775_v44, 0 }
  0xa2   : > { %681 = vmatpush1.bf16.msra.mxu0 %v672_v40  ;;  %712 = vmatprep.mubr.bf16.mxu0 %v1658_v1 }
  0xa3   : > { %v771_v43 = vpop.permute.xlu0 %770 }
  0xa4   : > { %v776_v45 = vsel %vm774_vm6, %v769_v39, %v771_v43  ;;  %v777_v46 = vsel %vm774_vm6, %v771_v43, %v773_v42 }
  0xa5   : > { %1495 = vmatprep.subr.msk.bf16.mxu0 %vm360_vm2, %v776_v45  ;;  %v788_v48 = vsel %vm360_vm2, %v777_v46, 0  ;;  %v879_v49 = vpop.permute.xlu1 %878 }
  0xa7   : > { %v877_v51 = vpop.permute.xlu0 %876  ;;  %1557 = vmatmul.mubr.msk.bf16.vlgmr.msra.gmra.mrb[12].mxu1 %vm356_vm3, %v1490_v47 }
  0xa8   : > { %1561 = vmatpush3.bf16.msra.mxu1 %v788_v48  ;;  %1562 = vmatprep.mubr.msk.bf16.mxu1 %vm1659_vm0, %v1657_v0  ;;  %v885_v54 = vsel %vm884_vm7, %v877_v51, %v879_v49 }
  0xa9   : > { %1492 = vmatmul.mubr.msk.bf16.vlgmr.msra.gmra.mrb[12].mxu0 %vm356_vm3, %v1490_v47  ;;  %v883_v52 = vpop.permute.xlu1 %882  ;;  %1566 = vmatprep.subr.bf16.mxu1 %v1657_v0  ;;  %v892_v60 = vsel %vm360_vm2, %v885_v54, 0 }
  0xaa   : > { %791 = vmatpush1.bf16.msra.mxu0 %v782_v50  ;;  %822 = vmatprep.mubr.bf16.mxu0 %v1658_v1 }
  0xab   : > { %v881_v53 = vpop.permute.xlu0 %880 }
  0xac   : > { %v886_v55 = vsel %vm884_vm7, %v879_v49, %v881_v53  ;;  %v887_v56 = vsel %vm884_vm7, %v881_v53, %v883_v52 }
  0xad   : > { %1499 = vmatprep.subr.msk.bf16.mxu0 %vm360_vm2, %v886_v55  ;;  %v898_v58 = vsel %vm360_vm2, %v887_v56, 0  ;;  %v989_v59 = vpop.permute.xlu1 %988 }
  0xaf   : > { %v987_v61 = vpop.permute.xlu0 %986  ;;  %1563 = vmatmul.mubr.msk.bf16.vlgmr.msra.gmra.mrb[16].mxu1 %vm356_vm3, %v1494_v57 }
  0xb0   : > { %1567 = vmatpush3.bf16.msra.mxu1 %v898_v58  ;;  %1568 = vmatprep.mubr.msk.bf16.mxu1 %vm1659_vm0, %v1657_v0  ;;  %v995_v2 = vsel %vm994_vm8, %v987_v61, %v989_v59 }
  0xb1   : > { %1496 = vmatmul.mubr.msk.bf16.vlgmr.msra.gmra.mrb[16].mxu0 %vm356_vm3, %v1494_v57  ;;  %v993_v62 = vpop.permute.xlu1 %992  ;;  %1572 = vmatprep.subr.bf16.mxu1 %v1657_v0  ;;  %v1002_v8 = vsel %vm360_vm2, %v995_v2, 0 }
  0xb2   : > { %901 = vmatpush1.bf16.msra.mxu0 %v892_v60  ;;  %932 = vmatprep.mubr.bf16.mxu0 %v1658_v1 }
  0xb3   : > { %v991_v63 = vpop.permute.xlu0 %990 }
  0xb4   : > { %v996_v3 = vsel %vm994_vm8, %v989_v59, %v991_v63  ;;  %v997_v4 = vsel %vm994_vm8, %v991_v63, %v993_v62 }
  0xb5   : > { %1503 = vmatprep.subr.msk.bf16.mxu0 %vm360_vm2, %v996_v3  ;;  %v1008_v6 = vsel %vm360_vm2, %v997_v4, 0  ;;  %v1099_v7 = vpop.permute.xlu1 %1098 }
  0xb7   : > { %v1097_v9 = vpop.permute.xlu0 %1096  ;;  %1569 = vmatmul.mubr.msk.bf16.vlgmr.msra.gmra.mrb[20].mxu1 %vm356_vm3, %v1498_v5 }
  0xb8   : > { %1573 = vmatpush3.bf16.msra.mxu1 %v1008_v6  ;;  %1574 = vmatprep.mubr.msk.bf16.mxu1 %vm1659_vm0, %v1657_v0  ;;  %v1105_v12 = vsel %vm1104_vm9, %v1097_v9, %v1099_v7 }
  0xb9   : > { %1500 = vmatmul.mubr.msk.bf16.vlgmr.msra.gmra.mrb[20].mxu0 %vm356_vm3, %v1498_v5  ;;  %v1103_v10 = vpop.permute.xlu1 %1102  ;;  %1578 = vmatprep.subr.bf16.mxu1 %v1657_v0  ;;  %v1112_v18 = vsel %vm360_vm2, %v1105_v12, 0 }
  0xba   : > { %1011 = vmatpush1.bf16.msra.mxu0 %v1002_v8  ;;  %1042 = vmatprep.mubr.bf16.mxu0 %v1658_v1 }
  0xbb   : > { %v1101_v11 = vpop.permute.xlu0 %1100 }
  0xbc   : > { %v1106_v13 = vsel %vm1104_vm9, %v1099_v7, %v1101_v11  ;;  %v1107_v14 = vsel %vm1104_vm9, %v1101_v11, %v1103_v10 }
  0xbd   : > { %1507 = vmatprep.subr.msk.bf16.mxu0 %vm360_vm2, %v1106_v13  ;;  %v1118_v16 = vsel %vm360_vm2, %v1107_v14, 0  ;;  %v1209_v17 = vpop.permute.xlu1 %1208 }
  0xbf   : > { %v1207_v19 = vpop.permute.xlu0 %1206  ;;  %1575 = vmatmul.mubr.msk.bf16.vlgmr.msra.gmra.mrb[24].mxu1 %vm356_vm3, %v1502_v15 }
  0xc0   : > { %1579 = vmatpush3.bf16.msra.mxu1 %v1118_v16  ;;  %1580 = vmatprep.mubr.msk.bf16.mxu1 %vm1659_vm0, %v1657_v0  ;;  %v1215_v22 = vsel %vm1214_vm10, %v1207_v19, %v1209_v17 }
  0xc1   : > { %1504 = vmatmul.mubr.msk.bf16.vlgmr.msra.gmra.mrb[24].mxu0 %vm356_vm3, %v1502_v15  ;;  %v1213_v20 = vpop.permute.xlu1 %1212  ;;  %1584 = vmatprep.subr.bf16.mxu1 %v1657_v0  ;;  %v1222_v27 = vsel %vm360_vm2, %v1215_v22, 0 }
  0xc2   : > { %1121 = vmatpush1.bf16.msra.mxu0 %v1112_v18  ;;  %1152 = vmatprep.mubr.bf16.mxu0 %v1658_v1 }
  0xc3   : > { %v1211_v21 = vpop.permute.xlu0 %1210 }
  0xc4   : > { %v1216_v23 = vsel %vm1214_vm10, %v1209_v17, %v1211_v21  ;;  %v1217_v24 = vsel %vm1214_vm10, %v1211_v21, %v1213_v20 }
  0xc5   : > { %1511 = vmatprep.subr.msk.bf16.mxu0 %vm360_vm2, %v1216_v23  ;;  %v1228_v26 = vsel %vm360_vm2, %v1217_v24, 0 }
  0xc7   : > { %1581 = vmatmul.mubr.msk.bf16.vlgmr.msra.gmra.mrb[28].mxu1 %vm356_vm3, %v1506_v25 }
  0xc8   : > { %1585 = vmatpush3.bf16.msra.mxu1 %v1228_v26  ;;  %1586 = vmatprep.mubr.msk.bf16.mxu1 %vm1659_vm0, %v1657_v0 }
  0xc9   : > { %1508 = vmatmul.mubr.msk.bf16.vlgmr.msra.gmra.mrb[28].mxu0 %vm356_vm3, %v1506_v25 }
  0xca   : > { %1231 = vmatpush1.bf16.msra.mxu0 %v1222_v27  ;;  %1262 = vmatprep.mubr.bf16.mxu0 %v1658_v1 }
  0xcf   : > { %1587 = vmatmul.mubr.msk.bf16.vlgmr.msra.gmra.mrb[32].mxu1 %vm356_vm3, %v1510_v28 }
  0xd1   : > { %1512 = vmatmul.mubr.msk.bf16.vlgmr.msra.gmra.mrb[32].mxu0 %vm356_vm3, %v1510_v28 }
 0x162   : > { %v445_v29 = vpop.f32.mrb[0].mxu1 }
 0x163   : > { %v1540_v31 = vpop.f32.mrb[1].mxu1 }
 0x164   : > { %v404_v30 = vpop.f32.mrb[0].mxu0  ;;  %v448_v33 = vpop.f32.mrb[2].mxu1 }
 0x165   : > { %v406_v32 = vpop.f32.mrb[1].mxu0  ;;  %v1541_v35 = vpop.f32.mrb[3].mxu1 }
 0x166   : > { %v408_v34 = vpop.f32.mrb[2].mxu0 }
 0x167   : > { %v409_v36 = vpop.f32.mrb[3].mxu0 }
 0x16a   : > { %v538_v1 = vpop.f32.mrb[4].mxu1 }
 0x16b   : > { %v539_v38 = vadd.f32 %v538_v1, %v445_v29  ;;  %v1546_v0 = vpop.f32.mrb[5].mxu1 }
 0x16c   : > { %v497_v37 = vpop.f32.mrb[4].mxu0  ;;  %v541_v41 = vpop.f32.mrb[6].mxu1 }
 0x16d   : > { %v498_v39 = vadd.f32 %v497_v37, %v404_v30  ;;  %v499_v40 = vpop.f32.mrb[5].mxu0  ;;  %v1547_v44 = vpop.f32.mrb[7].mxu1 }
 0x16e   : > { %v500_v42 = vadd.f32 %v499_v40, %v406_v32  ;;  %v501_v43 = vpop.f32.mrb[6].mxu0 }
 0x16f   : > { %v502_v45 = vpop.f32.mrb[7].mxu0 }
 0x172   : > { %v645_v46 = vpop.f32.mrb[8].mxu1 }
 0x173   : > { %v653_v48 = vadd.f32 %v645_v46, %v539_v38  ;;  %v1552_v49 = vpop.f32.mrb[9].mxu1  ;;  %v1328_v38 = vlaneseq }
 0x174   : > { %v604_v47 = vpop.f32.mrb[8].mxu0  ;;  %v648_v52 = vpop.f32.mrb[10].mxu1 }
 0x175   : > { %v651_v50 = vadd.f32 %v604_v47, %v498_v39  ;;  %v606_v51 = vpop.f32.mrb[9].mxu0  ;;  %v1553_v55 = vpop.f32.mrb[11].mxu1  ;;  %v1326_v52 = vld [vmem:[%s1880_s4] sm:$0x7] }
 0x176   : > { %v652_v53 = vadd.f32 %v606_v51, %v500_v42  ;;  %v608_v54 = vpop.f32.mrb[10].mxu0 }
 0x177   : > { %v609_v56 = vpop.f32.mrb[11].mxu0  ;;  %v1318_v54 = vpop.permute.xlu0 %1317 }
 0x17a   : > { %v755_v57 = vpop.f32.mrb[12].mxu1 }
 0x17b   : > { %v763_v59 = vadd.f32 %v755_v57, %v653_v48  ;;  %v1558_v60 = vpop.f32.mrb[13].mxu1  ;;  %v1329_v48 = vshrl.u32 %v1328_v38, 7 }
 0x17c   : > { %v714_v58 = vpop.f32.mrb[12].mxu0  ;;  %v758_v63 = vpop.f32.mrb[14].mxu1 }
 0x17d   : > { %v761_v61 = vadd.f32 %v714_v58, %v651_v50  ;;  %v716_v62 = vpop.f32.mrb[13].mxu0  ;;  %v1559_v4 = vpop.f32.mrb[15].mxu1  ;;  %v1338_v50 = vsub.s32 2, %v1329_v48  ;;  %v1334_v58 = vsub.s32 1, %v1329_v48 }
 0x17e   : > { %v762_v2 = vadd.f32 %v716_v62, %v652_v53  ;;  %v718_v3 = vpop.f32.mrb[14].mxu0  ;;  %v1330_v53 = vsub.s32 0, %v1329_v48 }
 0x17f   : > { %v719_v5 = vpop.f32.mrb[15].mxu0  ;;  %v1339_v63 = vrot.slane %v1326_v52, %v1338_v50 }
 0x180   : > { %v1331_v5 = vrot.slane %v1326_v52, %v1330_v53 }
 0x182   : > { %v865_v6 = vpop.f32.mrb[16].mxu1 }
 0x183   : > { %v873_v8 = vadd.f32 %v865_v6, %v763_v59  ;;  %v1564_v9 = vpop.f32.mrb[17].mxu1 }
 0x184   : > { %v824_v7 = vpop.f32.mrb[16].mxu0  ;;  %v868_v12 = vpop.f32.mrb[18].mxu1 }
 0x185   : > { %v871_v10 = vadd.f32 %v824_v7, %v761_v61  ;;  %v826_v11 = vpop.f32.mrb[17].mxu0  ;;  %v1565_v15 = vpop.f32.mrb[19].mxu1 }
 0x186   : > { %v872_v13 = vadd.f32 %v826_v11, %v762_v2  ;;  %v828_v14 = vpop.f32.mrb[18].mxu0 }
 0x187   : > { %v829_v16 = vpop.f32.mrb[19].mxu0 }
 0x18a   : > { %v975_v17 = vpop.f32.mrb[20].mxu1 }
 0x18b   : > { %v983_v19 = vadd.f32 %v975_v17, %v873_v8  ;;  %v1570_v20 = vpop.f32.mrb[21].mxu1  ;;  %v1335_v8 = vrot.slane %v1326_v52, %v1334_v58 }
 0x18c   : > { %v934_v18 = vpop.f32.mrb[20].mxu0  ;;  %v978_v23 = vpop.f32.mrb[22].mxu1 }
 0x18d   : > { %v981_v21 = vadd.f32 %v934_v18, %v871_v10  ;;  %v936_v22 = vpop.f32.mrb[21].mxu0  ;;  %v1571_v26 = vpop.f32.mrb[23].mxu1 }
 0x18e   : > { %v982_v24 = vadd.f32 %v936_v22, %v872_v13  ;;  %v938_v25 = vpop.f32.mrb[22].mxu0 }
 0x18f   : > { %v939_v27 = vpop.f32.mrb[23].mxu0 }
 0x192   : > { %v1085_v28 = vpop.f32.mrb[24].mxu1 }
 0x193   : > { %v1093_v30 = vadd.f32 %v1085_v28, %v983_v19  ;;  %v1576_v31 = vpop.f32.mrb[25].mxu1 }
 0x194   : > { %v1044_v29 = vpop.f32.mrb[24].mxu0  ;;  %v1088_v34 = vpop.f32.mrb[26].mxu1 }
 0x195   : > { %v1091_v32 = vadd.f32 %v1044_v29, %v981_v21  ;;  %v1046_v33 = vpop.f32.mrb[25].mxu0  ;;  %v1577_v1 = vpop.f32.mrb[27].mxu1 }
 0x196   : > { %v1092_v35 = vadd.f32 %v1046_v33, %v982_v24  ;;  %v1048_v36 = vpop.f32.mrb[26].mxu0 }
 0x197   : > { %v1049_v37 = vpop.f32.mrb[27].mxu0 }
 0x19a   : > { %v1195_v0 = vpop.f32.mrb[28].mxu1 }
 0x19b   : > { %v1203_v40 = vadd.f32 %v1195_v0, %v1093_v30  ;;  %v1582_v41 = vpop.f32.mrb[29].mxu1 }
 0x19c   : > { %v1154_v39 = vpop.f32.mrb[28].mxu0  ;;  %v1198_v44 = vpop.f32.mrb[30].mxu1 }
 0x19d   : > { %v1201_v42 = vadd.f32 %v1154_v39, %v1091_v32  ;;  %v1156_v43 = vpop.f32.mrb[29].mxu0  ;;  %v1583_v47 = vpop.f32.mrb[31].mxu1 }
 0x19e   : > { %v1202_v45 = vadd.f32 %v1156_v43, %v1092_v35  ;;  %v1158_v46 = vpop.f32.mrb[30].mxu0 }
 0x19f   : > { %v1159_v49 = vpop.f32.mrb[31].mxu0 }
 0x1a2   : > { %v1305_v51 = vpop.f32.mrb[32].mxu1 }
 0x1a3   : > { %v1313_v56 = vadd.f32 %v1305_v51, %v1203_v40  ;;  %v1588_v57 = vpop.f32.mrb[33].mxu1 }
 0x1a4   : > { %v1264_v55 = vpop.f32.mrb[32].mxu0  ;;  %v1308_v61 = vpop.f32.mrb[34].mxu1 }
 0x1a5   : > { %v1311_v59 = vadd.f32 %v1264_v55, %v1201_v42  ;;  %v1266_v60 = vpop.f32.mrb[33].mxu0  ;;  %v1322_v2 = vadd.f32 %v1318_v54, %v1313_v56  ;;  %v1589_v4 = vpop.f32.mrb[35].mxu1 }
 0x1a6   : > { %v1312_v62 = vadd.f32 %v1266_v60, %v1202_v45  ;;  %v1268_v3 = vpop.f32.mrb[34].mxu0 }
 0x1a7   : > { %v1320_v6 = vadd.f32 %v1318_v54, %v1311_v59  ;;  %v1269_v7 = vpop.f32.mrb[35].mxu0  ;;  %v1325_v10 = vmax.f32 %v1322_v2, 0.0 }
 0x1a8   : > { %v1321_v9 = vadd.f32 %v1318_v54, %v1312_v62 }
 0x1a9   : > { %v1323_v11 = vmax.f32 %v1320_v6, 0.0  ;;  %v1345_v13 = vmul.f32 %v1339_v63, %v1325_v10 }
 0x1aa   : > { %v1324_v12 = vmax.f32 %v1321_v9, 0.0 }
 0x1ab   : > { %v1343_v14 = vmul.f32 %v1331_v5, %v1323_v11  ;;  %1348 = vst [vmem:[%s324_s16 + $0x10] sm:$0xff] %v1345_v13 }
 0x1ac   : > { %v1344_v15 = vmul.f32 %v1335_v8, %v1324_v12 }
 0x1ad   : > { %1346 = vst [vmem:[%s324_s16] sm:$0xff] %v1343_v14 }
 0x1ae   : > { %1347 = vst [vmem:[%s324_s16 + $0x8] sm:$0xff] %v1344_v15 }
 0x1af PF: > { %s15_s20 = sadd.s32 1, %s1655_s20   ;;  %s1882_s18 = smov %s1651_s19 }
 0x1b0   : > { %p12_p5 = scmp.ge.s32.totalorder %s15_s20, 4   ;;  %s1883_s19 = smov %s1885_s21 }
 0x1b2   :  { %14 = sbr.rel (!%p12_p5) target bundleno = 2 (0x2), region = 84 }

// kernel: double_conv_forward.2
= control target key start
LH: loop header
LB: loop body
LE: loop exit
PB: predicated region body
PF: predicated region fallthrough
CT: control target
= control target key end

     0   :  { %s1751_s18 = smov 0   ;;  %s1753_s19 = smov 0   ;;  %s1960_s0 = inlined_call_operand.vmem [shape: bf16[2,4,1152], index: 0, kind: input, shape index: {}, may-alias: {0,1}]   ;;  %s1961_s1 = inlined_call_operand.vmem [shape: bf16[2,4,1152], index: 1, kind: input, shape index: {}, may-alias: {0,1}]   ;;  %s1962_s2 = inlined_call_operand.vmem [shape: bf16[9,8,4], index: 2, kind: input, shape index: {}]   ;;  %s1963_s3 = inlined_call_operand.vmem [shape: f32[8,1], index: 3, kind: input, shape index: {}]   ;;  %s1964_s4 = inlined_call_operand.vmem [shape: f32[1,768], index: 4, kind: input, shape index: {}]   ;;  %s1965_s5 = inlined_call_operand.vmem [shape: bf16[2,8,768], index: 5, kind: output, shape index: {}]  }
   0x1   :  { %s1755_s20 = smov 0   ;;  %s1757_s21 = smov 0  }
   0x2   :  { %s1759_s22 = smov 0  }
   0x3 LB: > { %s24_s23 = sadd.s32 1, %s1699_s20  ;;  %s27_s24 = sadd.s32 1, %s1703_s21  ;;  %s1707_s22 = sphi %s1759_s22, %s15_s22   ;;  %s1703_s21 = sphi %s1757_s21, %s1969_s21   ;;  %s1699_s20 = sphi %s1755_s20, %s1968_s20   ;;  %s1695_s19 = sphi %s1753_s19, %s1967_s19   ;;  %s1691_s18 = sphi %s1751_s18, %s1966_s18  }
   0x4   : > { %p25_p0 = scmp.ge.s32.totalorder %s24_s23, 2  ;;  %p1495_p1 = scmp.ge.s32.totalorder %s1707_s22, 1 }
   0x5   : > { %p239_p2 = scmp.lt.s32.totalorder %s1707_s22, 5 }
   0x6   : > { %s1971_s23 = smov (%p25_p0, %s24_s23), 0  ;;  %s1973_s24 = smov (!%p25_p0, %s27_s24), %s1703_s21 }
   0x7   : > { %p240_p3 = pnand %p1495_p1, %p239_p2  ;;  %p29_p4 = scmp.ge.s32.totalorder %s1973_s24, 2 }
   0x8   : > { %s1781_s25 = smul.u32 (!%p240_p3), 3, %s1691_s18  ;;  %p290_p5 = scmp.lt.s32.totalorder (!%p240_p3), %s1695_s19, 1  ;;  %v334_v0 = vlaneseq (!%p240_p3)  ;;  %v1709_v1 = vmov (!%p240_p3), 1983009808   ;;  %v1710_v6 = vmov (!%p240_p3), 0.0   ;;  %v1711_v7 = vmov (!%p240_p3), 0  }
   0x9   : > { %s1975_s24 = smov (%p29_p4, %s1973_s24), 0  ;;  %243 = sbr.rel (%p240_p3) target bundleno = 439 (0x1b7), region = 40 }
   0xa   : > { %v332_v2 = vunpack.c.l.s4 (!%p240_p3), %v1709_v1  ;;  %s299_s26 = sadd.s32 (!%p240_p3), 1, %s1691_s18  ;;  %p292_p6 = scmp.lt.s32.totalorder (!%p240_p3), %s1781_s25, 8  ;;  %v1786_v4 = vshrl.u32 (!%p240_p3), %v334_v0, 7  ;;  %1559 = vmatprep.subr.bf16.mxu1 (!%p240_p3), %v1710_v6  ;;  %415 = vmatprep.mubr.bf16.mxu0 (!%p240_p3), %v1711_v7  ;;  %vm1712_vm0 = vmmov (!%p240_p3), 0   ;;  %v1327_v14 = vld [vmem:[%s1963_s3] sm:$0xff] (!%p240_p3)  ;;  %vm365_vm1 = vcmask (!%p240_p3), 1039360  }
   0xb   : > { %s300_s27 = smul.u32 (!%p240_p3), 3, %s299_s26  ;;  %1667 = vset.pattern.permute.xlu0 (!%p240_p3), %v1711_v7  ;;  %1561 = vmatprep.mubr.msk.bf16.mxu1 (!%p240_p3), %vm1712_vm0, %v1710_v6  ;;  %s1713_s11 = smov (!%p240_p3), 127   ;;  %vm373_vm2 = vcmask (!%p240_p3), 1041408   ;;  %v1500_v23 = vld [vmem:[%s1962_s2 + $0x4] sm:$0xf] (!%p240_p3)  ;;  %vm369_vm3 = vcmask (!%p240_p3), 31744  }
   0xc   : > { %v333_v3 = vunpack.c.0.s8 (!%p240_p3), %v332_v2  ;;  %s1714_s16 = smov (!%p240_p3), 126   ;;  %s1715_s17 = smov (!%p240_p3), 110   ;;  %vm567_vm4 = vcmask (!%p240_p3), 1031168   ;;  %v354_v34 = vld [vmem:[%s1962_s2] sm:$0xf] (!%p240_p3)  ;;  %vm677_vm5 = vcmask (!%p240_p3), 900096  }
   0xd   : > { %p303_p7 = scmp.lt.s32.totalorder (!%p240_p3), %s300_s27, 8  ;;  %s1716_s18 = smov (!%p240_p3), 109   ;;  %v1507_v44 = vld [vmem:[%s1962_s2 + $0x8] sm:$0xf] (!%p240_p3)  ;;  %vm787_vm6 = vcmask (!%p240_p3), 891904   ;;  %vm897_vm7 = vcmask (!%p240_p3), 883712  }
   0xe   : > { %v336_v5 = vsub.s32 (!%p240_p3), %v333_v3, %v1786_v4  ;;  %s1717_s26 = smov (!%p240_p3), 108   ;;  %v1511_v54 = vld [vmem:[%s1962_s2 + $0xc] sm:$0xf] (!%p240_p3)  ;;  %v1515_v0 = vld [vmem:[%s1962_s2 + $0x10] sm:$0xf] (!%p240_p3)  ;;  %vm1007_vm8 = vcmask (!%p240_p3), 752640  }
   0xf   : > { %vm1117_vm9 = vcmask (!%p240_p3), 744448   ;;  %vm1227_vm10 = vcmask (!%p240_p3), 736256   ;;  %p312_p8 = scmp.lt.s32.totalorder (!%p240_p3), %s1781_s25, 5 }
  0x10   : > { %s1977_s19 = smov (!%p290_p5, %s1695_s19), 1  ;;  %s1979_s27 = smov (!%p303_p7, %s300_s27), 8 }
  0x11   : > { %s1613_s28 = smul.u32 9, %s1977_s19 }
  0x12   : > { %s293_s29 = scalar_select %p292_p6, %s1781_s25, 8 }
  0x13   : > { %s306_s10 = sadd.s32 %s1613_s28, %s1979_s27  ;;  %s1718_s27 = smov 92  }
  0x14   : > { %s295_s30 = sadd.s32 %s1613_s28, %s293_s29  ;;  %s1497_s12 = sshll.u32 %s306_s10, 1 }
  0x15   : > { %s1496_s6 = sshll.u32 %s295_s30, 1  ;;  %s308_s15 = scalar_lea.vmem %s1961_s1, %s1497_s12 }
  0x16   : > { %s297_s9 = scalar_lea.vmem %s1960_s0, %s1496_s6  ;;  %v1499_v13 = vld.sshfl [vmem:[%s308_s15] sm:$0x3f pattern:$0x76325410]  ;;  %s1719_s28 = smov 91  }
  0x17   : > { %v327_v8 = vld [vmem:[%s297_s9] sm:$0x3f]  ;;  %s1720_s29 = smov 90   ;;  %s1981_s25 = smov (!%p312_p8, %s1781_s25), 5 }
  0x18   : > { %v1799_v9 = vrot.slane %v327_v8, %v336_v5  ;;  %v330_v10 = vcombine.high %v327_v8, %v327_v8  ;;  %s314_s9 = scalar_lea.vmem %s1964_s4, %s1981_s25  ;;  %s1614_s10 = smul.u32 6, %s1977_s19 }
  0x1a   : > { %357 = vrot.lane.b32.xlu0 %v1799_v9, %s1713_s11  ;;  %v1802_v11 = vrot.slane %v330_v10, %v336_v5  ;;  %v345_v12 = vcombine.high %v1799_v9, %v1799_v9  ;;  %v468_v26 = vsel %vm373_vm2, %v1799_v9, 0 }
  0x1c   : > { %361 = vrot.lane.b32.xlu1 %v1802_v11, %s1713_s11  ;;  %v474_v28 = vsel %vm373_vm2, %v1802_v11, 0 }
  0x1e   : > { %359 = vrot.lane.b32.xlu0 %v345_v12, %s1713_s11 }
  0x20   : > { %363 = vrot.lane.b32.xlu1 %v1499_v13, %s1713_s11  ;;  %s322_s11 = sadd.s32 %s1614_s10, %s1981_s25 }
  0x21   : > { %s1498_s19 = sshll.u32 %s322_s11, 2 }
  0x22   : > { %559 = vrot.lane.b32.xlu0 %v1799_v9, %s1714_s16  ;;  %s324_s25 = scalar_lea.vmem %s1965_s5, %s1498_s19 }
  0x24   : > { %561 = vrot.lane.b32.xlu1 %v345_v12, %s1714_s16 }
  0x26   : > { %563 = vrot.lane.b32.xlu0 %v1802_v11, %s1714_s16 }
  0x28   : > { %565 = vrot.lane.b32.xlu1 %v1499_v13, %s1714_s16 }
  0x2a   : > { %669 = vrot.lane.b32.xlu0 %v1799_v9, %s1715_s17 }
  0x2c   : > { %671 = vrot.lane.b32.xlu1 %v345_v12, %s1715_s17 }
  0x2e   : > { %673 = vrot.lane.b32.xlu0 %v1802_v11, %s1715_s17 }
  0x30   : > { %675 = vrot.lane.b32.xlu1 %v1499_v13, %s1715_s17 }
  0x32   : > { %779 = vrot.lane.b32.xlu0 %v1799_v9, %s1716_s18 }
  0x34   : > { %781 = vrot.lane.b32.xlu1 %v345_v12, %s1716_s18 }
  0x36   : > { %783 = vrot.lane.b32.xlu0 %v1802_v11, %s1716_s18 }
  0x38   : > { %785 = vrot.lane.b32.xlu1 %v1499_v13, %s1716_s18 }
  0x3a   : > { %889 = vrot.lane.b32.xlu0 %v1799_v9, %s1717_s26 }
  0x3c   : > { %891 = vrot.lane.b32.xlu1 %v345_v12, %s1717_s26 }
  0x3e   : > { %893 = vrot.lane.b32.xlu0 %v1802_v11, %s1717_s26 }
  0x40   : > { %895 = vrot.lane.b32.xlu1 %v1499_v13, %s1717_s26 }
  0x42   : > { %999 = vrot.lane.b32.xlu0 %v1799_v9, %s1718_s27 }
  0x44   : > { %1001 = vrot.lane.b32.xlu1 %v345_v12, %s1718_s27 }
  0x46   : > { %1003 = vrot.lane.b32.xlu0 %v1802_v11, %s1718_s27 }
  0x48   : > { %1005 = vrot.lane.b32.xlu1 %v1499_v13, %s1718_s27 }
  0x4a   : > { %1109 = vrot.lane.b32.xlu0 %v1799_v9, %s1719_s28 }
  0x4c   : > { %1111 = vrot.lane.b32.xlu1 %v345_v12, %s1719_s28 }
  0x4e   : > { %1113 = vrot.lane.b32.xlu0 %v1802_v11, %s1719_s28 }
  0x50   : > { %1115 = vrot.lane.b32.xlu1 %v1499_v13, %s1719_s28 }
  0x52   : > { %1219 = vrot.lane.b32.xlu0 %v1799_v9, %s1720_s29 }
  0x54   : > { %1221 = vrot.lane.b32.xlu1 %v345_v12, %s1720_s29 }
  0x56   : > { %1223 = vrot.lane.b32.xlu0 %v1802_v11, %s1720_s29 }
  0x58   : > { %1225 = vrot.lane.b32.xlu1 %v1499_v13, %s1720_s29  ;;  %v1519_v13 = vld [vmem:[%s1962_s2 + $0x14] sm:$0xf] }
  0x5a   : > { %1330 = vperm.xlu0 %1667, %v1327_v14  }
  0x8c   : > { %v358_v15 = vpop.permute.xlu0 %357 }
  0x8e   : > { %v362_v16 = vpop.permute.xlu1 %361 }
  0x90   : > { %v360_v17 = vpop.permute.xlu0 %359 }
  0x91   : > { %v367_v18 = vsel %vm365_vm1, %v360_v17, %v362_v16  ;;  %v366_v19 = vsel %vm365_vm1, %v358_v15, %v360_v17 }
  0x92   : > { %1501 = vmatprep.subr.msk.bf16.mxu0 %vm373_vm2, %v367_v18  ;;  %v364_v20 = vpop.permute.xlu1 %363  ;;  %v375_v21 = vsel %vm373_vm2, %v366_v19, 0 }
  0x93   : > { %384 = vmatpush1.bf16.msra.mxu0 %v375_v21  ;;  %v368_v22 = vsel %vm365_vm1, %v362_v16, %v364_v20 }
  0x94   : > { %v381_v24 = vsel %vm373_vm2, %v368_v22, 0  ;;  %v560_v25 = vpop.permute.xlu0 %559  ;;  %1504 = vmatprep.subr.msk.bf16.mxu0 %vm373_vm2, %v345_v12 }
  0x95   : > { %1560 = vmatpush3.bf16.msra.mxu1 %v381_v24 }
  0x96   : > { %1502 = vmatmul.mubr.msk.bf16.vlgmr.msra.gmra.mrb[0].mxu0 %vm369_vm3, %v1500_v23  ;;  %1565 = vmatprep.subr.bf16.mxu1 %v1710_v6  ;;  %v562_v27 = vpop.permute.xlu1 %561 }
  0x97   : > { %477 = vmatpush1.bf16.msra.mxu0 %v468_v26  ;;  %508 = vmatprep.mubr.bf16.mxu0 %v1711_v7  ;;  %v568_v30 = vsel %vm567_vm4, %v560_v25, %v562_v27 }
  0x98   : > { %1562 = vmatmul.mubr.msk.bf16.vlgmr.msra.gmra.mrb[0].mxu1 %vm369_vm3, %v1500_v23  ;;  %v564_v29 = vpop.permute.xlu0 %563  ;;  %v575_v35 = vsel %vm373_vm2, %v568_v30, 0  ;;  %v1523_v23 = vld [vmem:[%s1962_s2 + $0x18] sm:$0xf] }
  0x99   : > { %1566 = vmatpush3.bf16.msra.mxu1 %v474_v28  ;;  %v569_v31 = vsel %vm567_vm4, %v562_v27, %v564_v29  ;;  %1567 = vmatprep.mubr.msk.bf16.mxu1 %vm1712_vm0, %v1710_v6 }
  0x9a   : > { %1508 = vmatprep.subr.msk.bf16.mxu0 %vm373_vm2, %v569_v31  ;;  %v566_v32 = vpop.permute.xlu1 %565  ;;  %1571 = vmatprep.subr.bf16.mxu1 %v1710_v6 }
  0x9b   : > { %v570_v33 = vsel %vm567_vm4, %v564_v29, %v566_v32 }
  0x9c   : > { %v670_v36 = vpop.permute.xlu0 %669  ;;  %v581_v37 = vsel %vm373_vm2, %v570_v33, 0  ;;  %v1527_v33 = vld [vmem:[%s1962_s2 + $0x1c] sm:$0xf] }
  0x9e   : > { %1505 = vmatmul.mubr.msk.bf16.vlgmr.msra.gmra.mrb[4].mxu0 %vm369_vm3, %v354_v34  ;;  %v672_v38 = vpop.permute.xlu1 %671 }
  0x9f   : > { %584 = vmatpush1.bf16.msra.mxu0 %v575_v35  ;;  %615 = vmatprep.mubr.bf16.mxu0 %v1711_v7  ;;  %v678_v40 = vsel %vm677_vm5, %v670_v36, %v672_v38  ;;  %v1531_v36 = vld [vmem:[%s1962_s2 + $0x20] sm:$0xf] }
  0xa0   : > { %1568 = vmatmul.mubr.msk.bf16.vlgmr.msra.gmra.mrb[4].mxu1 %vm369_vm3, %v354_v34  ;;  %v674_v39 = vpop.permute.xlu0 %673  ;;  %v685_v45 = vsel %vm373_vm2, %v678_v40, 0 }
  0xa1   : > { %1572 = vmatpush3.bf16.msra.mxu1 %v581_v37  ;;  %v679_v41 = vsel %vm677_vm5, %v672_v38, %v674_v39  ;;  %1573 = vmatprep.mubr.msk.bf16.mxu1 %vm1712_vm0, %v1710_v6 }
  0xa2   : > { %1512 = vmatprep.subr.msk.bf16.mxu0 %vm373_vm2, %v679_v41  ;;  %v676_v42 = vpop.permute.xlu1 %675  ;;  %1577 = vmatprep.subr.bf16.mxu1 %v1710_v6 }
  0xa3   : > { %v680_v43 = vsel %vm677_vm5, %v674_v39, %v676_v42 }
  0xa4   : > { %v780_v46 = vpop.permute.xlu0 %779  ;;  %v691_v47 = vsel %vm373_vm2, %v680_v43, 0 }
  0xa6   : > { %1509 = vmatmul.mubr.msk.bf16.vlgmr.msra.gmra.mrb[8].mxu0 %vm369_vm3, %v1507_v44  ;;  %v782_v48 = vpop.permute.xlu1 %781 }
  0xa7   : > { %694 = vmatpush1.bf16.msra.mxu0 %v685_v45  ;;  %725 = vmatprep.mubr.bf16.mxu0 %v1711_v7  ;;  %v788_v50 = vsel %vm787_vm6, %v780_v46, %v782_v48 }
  0xa8   : > { %1574 = vmatmul.mubr.msk.bf16.vlgmr.msra.gmra.mrb[8].mxu1 %vm369_vm3, %v1507_v44  ;;  %v784_v49 = vpop.permute.xlu0 %783  ;;  %v795_v55 = vsel %vm373_vm2, %v788_v50, 0 }
  0xa9   : > { %1578 = vmatpush3.bf16.msra.mxu1 %v691_v47  ;;  %v789_v51 = vsel %vm787_vm6, %v782_v48, %v784_v49  ;;  %1579 = vmatprep.mubr.msk.bf16.mxu1 %vm1712_vm0, %v1710_v6 }
  0xaa   : > { %1516 = vmatprep.subr.msk.bf16.mxu0 %vm373_vm2, %v789_v51  ;;  %v786_v52 = vpop.permute.xlu1 %785  ;;  %1583 = vmatprep.subr.bf16.mxu1 %v1710_v6 }
  0xab   : > { %v790_v53 = vsel %vm787_vm6, %v784_v49, %v786_v52 }
  0xac   : > { %v890_v56 = vpop.permute.xlu0 %889  ;;  %v801_v57 = vsel %vm373_vm2, %v790_v53, 0 }
  0xae   : > { %1513 = vmatmul.mubr.msk.bf16.vlgmr.msra.gmra.mrb[12].mxu0 %vm369_vm3, %v1511_v54  ;;  %v892_v58 = vpop.permute.xlu1 %891 }
  0xaf   : > { %804 = vmatpush1.bf16.msra.mxu0 %v795_v55  ;;  %835 = vmatprep.mubr.bf16.mxu0 %v1711_v7  ;;  %v898_v60 = vsel %vm897_vm7, %v890_v56, %v892_v58 }
  0xb0   : > { %1580 = vmatmul.mubr.msk.bf16.vlgmr.msra.gmra.mrb[12].mxu1 %vm369_vm3, %v1511_v54  ;;  %v894_v59 = vpop.permute.xlu0 %893  ;;  %v905_v1 = vsel %vm373_vm2, %v898_v60, 0 }
  0xb1   : > { %1584 = vmatpush3.bf16.msra.mxu1 %v801_v57  ;;  %v899_v61 = vsel %vm897_vm7, %v892_v58, %v894_v59  ;;  %1585 = vmatprep.mubr.msk.bf16.mxu1 %vm1712_vm0, %v1710_v6 }
  0xb2   : > { %1520 = vmatprep.subr.msk.bf16.mxu0 %vm373_vm2, %v899_v61  ;;  %v896_v62 = vpop.permute.xlu1 %895  ;;  %1589 = vmatprep.subr.bf16.mxu1 %v1710_v6 }
  0xb3   : > { %v900_v63 = vsel %vm897_vm7, %v894_v59, %v896_v62 }
  0xb4   : > { %v1000_v2 = vpop.permute.xlu0 %999  ;;  %v911_v3 = vsel %vm373_vm2, %v900_v63, 0 }
  0xb6   : > { %1517 = vmatmul.mubr.msk.bf16.vlgmr.msra.gmra.mrb[16].mxu0 %vm369_vm3, %v1515_v0  ;;  %v1002_v5 = vpop.permute.xlu1 %1001 }
  0xb7   : > { %914 = vmatpush1.bf16.msra.mxu0 %v905_v1  ;;  %945 = vmatprep.mubr.bf16.mxu0 %v1711_v7  ;;  %v1008_v9 = vsel %vm1007_vm8, %v1000_v2, %v1002_v5 }
  0xb8   : > { %1586 = vmatmul.mubr.msk.bf16.vlgmr.msra.gmra.mrb[16].mxu1 %vm369_vm3, %v1515_v0  ;;  %v1004_v8 = vpop.permute.xlu0 %1003  ;;  %v1015_v14 = vsel %vm373_vm2, %v1008_v9, 0 }
  0xb9   : > { %1590 = vmatpush3.bf16.msra.mxu1 %v911_v3  ;;  %v1009_v10 = vsel %vm1007_vm8, %v1002_v5, %v1004_v8  ;;  %1591 = vmatprep.mubr.msk.bf16.mxu1 %vm1712_vm0, %v1710_v6 }
  0xba   : > { %1524 = vmatprep.subr.msk.bf16.mxu0 %vm373_vm2, %v1009_v10  ;;  %v1006_v11 = vpop.permute.xlu1 %1005  ;;  %1595 = vmatprep.subr.bf16.mxu1 %v1710_v6 }
  0xbb   : > { %v1010_v12 = vsel %vm1007_vm8, %v1004_v8, %v1006_v11 }
  0xbc   : > { %v1110_v15 = vpop.permute.xlu0 %1109  ;;  %v1021_v16 = vsel %vm373_vm2, %v1010_v12, 0 }
  0xbe   : > { %1521 = vmatmul.mubr.msk.bf16.vlgmr.msra.gmra.mrb[20].mxu0 %vm369_vm3, %v1519_v13  ;;  %v1112_v17 = vpop.permute.xlu1 %1111 }
  0xbf   : > { %1024 = vmatpush1.bf16.msra.mxu0 %v1015_v14  ;;  %1055 = vmatprep.mubr.bf16.mxu0 %v1711_v7  ;;  %v1118_v19 = vsel %vm1117_vm9, %v1110_v15, %v1112_v17 }
  0xc0   : > { %1592 = vmatmul.mubr.msk.bf16.vlgmr.msra.gmra.mrb[20].mxu1 %vm369_vm3, %v1519_v13  ;;  %v1114_v18 = vpop.permute.xlu0 %1113  ;;  %v1125_v24 = vsel %vm373_vm2, %v1118_v19, 0 }
  0xc1   : > { %1596 = vmatpush3.bf16.msra.mxu1 %v1021_v16  ;;  %v1119_v20 = vsel %vm1117_vm9, %v1112_v17, %v1114_v18  ;;  %1597 = vmatprep.mubr.msk.bf16.mxu1 %vm1712_vm0, %v1710_v6 }
  0xc2   : > { %1528 = vmatprep.subr.msk.bf16.mxu0 %vm373_vm2, %v1119_v20  ;;  %v1116_v21 = vpop.permute.xlu1 %1115  ;;  %1601 = vmatprep.subr.bf16.mxu1 %v1710_v6 }
  0xc3   : > { %v1120_v22 = vsel %vm1117_vm9, %v1114_v18, %v1116_v21 }
  0xc4   : > { %v1220_v25 = vpop.permute.xlu0 %1219  ;;  %v1131_v26 = vsel %vm373_vm2, %v1120_v22, 0 }
  0xc6   : > { %1525 = vmatmul.mubr.msk.bf16.vlgmr.msra.gmra.mrb[24].mxu0 %vm369_vm3, %v1523_v23  ;;  %v1222_v27 = vpop.permute.xlu1 %1221 }
  0xc7   : > { %1134 = vmatpush1.bf16.msra.mxu0 %v1125_v24  ;;  %1165 = vmatprep.mubr.bf16.mxu0 %v1711_v7  ;;  %v1228_v29 = vsel %vm1227_vm10, %v1220_v25, %v1222_v27 }
  0xc8   : > { %1598 = vmatmul.mubr.msk.bf16.vlgmr.msra.gmra.mrb[24].mxu1 %vm369_vm3, %v1523_v23  ;;  %v1224_v28 = vpop.permute.xlu0 %1223  ;;  %v1235_v34 = vsel %vm373_vm2, %v1228_v29, 0 }
  0xc9   : > { %1602 = vmatpush3.bf16.msra.mxu1 %v1131_v26  ;;  %v1229_v30 = vsel %vm1227_vm10, %v1222_v27, %v1224_v28  ;;  %1603 = vmatprep.mubr.msk.bf16.mxu1 %vm1712_vm0, %v1710_v6 }
  0xca   : > { %1532 = vmatprep.subr.msk.bf16.mxu0 %vm373_vm2, %v1229_v30  ;;  %v1226_v31 = vpop.permute.xlu1 %1225  ;;  %1607 = vmatprep.subr.bf16.mxu1 %v1710_v6 }
  0xcb   : > { %v1230_v32 = vsel %vm1227_vm10, %v1224_v28, %v1226_v31 }
  0xcc   : > { %v1241_v35 = vsel %vm373_vm2, %v1230_v32, 0 }
  0xce   : > { %1529 = vmatmul.mubr.msk.bf16.vlgmr.msra.gmra.mrb[28].mxu0 %vm369_vm3, %v1527_v33 }
  0xcf   : > { %1244 = vmatpush1.bf16.msra.mxu0 %v1235_v34  ;;  %1275 = vmatprep.mubr.bf16.mxu0 %v1711_v7 }
  0xd0   : > { %1604 = vmatmul.mubr.msk.bf16.vlgmr.msra.gmra.mrb[28].mxu1 %vm369_vm3, %v1527_v33 }
  0xd1   : > { %1608 = vmatpush3.bf16.msra.mxu1 %v1241_v35  ;;  %1609 = vmatprep.mubr.msk.bf16.mxu1 %vm1712_vm0, %v1710_v6 }
  0xd6   : > { %1533 = vmatmul.mubr.msk.bf16.vlgmr.msra.gmra.mrb[32].mxu0 %vm369_vm3, %v1531_v36 }
  0xd8   : > { %1610 = vmatmul.mubr.msk.bf16.vlgmr.msra.gmra.mrb[32].mxu1 %vm369_vm3, %v1531_v36 }
 0x169   : > { %v417_v37 = vpop.f32.mrb[0].mxu0 }
 0x16a   : > { %v419_v38 = vpop.f32.mrb[1].mxu0 }
 0x16b   : > { %v421_v39 = vpop.f32.mrb[2].mxu0  ;;  %v458_v40 = vpop.f32.mrb[0].mxu1 }
 0x16c   : > { %v422_v41 = vpop.f32.mrb[3].mxu0  ;;  %v1563_v7 = vpop.f32.mrb[1].mxu1 }
 0x16d   : > { %v461_v42 = vpop.f32.mrb[2].mxu1 }
 0x16e   : > { %v1564_v43 = vpop.f32.mrb[3].mxu1 }
 0x171   : > { %v510_v44 = vpop.f32.mrb[4].mxu0 }
 0x172   : > { %v511_v45 = vadd.f32 %v510_v44, %v417_v37  ;;  %v512_v46 = vpop.f32.mrb[5].mxu0 }
 0x173   : > { %v513_v6 = vadd.f32 %v512_v46, %v419_v38  ;;  %v514_v47 = vpop.f32.mrb[6].mxu0  ;;  %v551_v48 = vpop.f32.mrb[4].mxu1 }
 0x174   : > { %v552_v49 = vadd.f32 %v551_v48, %v458_v40  ;;  %v515_v50 = vpop.f32.mrb[7].mxu0  ;;  %v1569_v51 = vpop.f32.mrb[5].mxu1 }
 0x175   : > { %v554_v52 = vpop.f32.mrb[6].mxu1 }
 0x176   : > { %v1570_v53 = vpop.f32.mrb[7].mxu1 }
 0x179   : > { %v617_v54 = vpop.f32.mrb[8].mxu0 }
 0x17a   : > { %v664_v55 = vadd.f32 %v617_v54, %v511_v45  ;;  %v619_v56 = vpop.f32.mrb[9].mxu0 }
 0x17b   : > { %v665_v57 = vadd.f32 %v619_v56, %v513_v6  ;;  %v621_v58 = vpop.f32.mrb[10].mxu0  ;;  %v658_v59 = vpop.f32.mrb[8].mxu1 }
 0x17c   : > { %v666_v60 = vadd.f32 %v658_v59, %v552_v49  ;;  %v622_v61 = vpop.f32.mrb[11].mxu0  ;;  %v1575_v62 = vpop.f32.mrb[9].mxu1  ;;  %v1339_v59 = vld [vmem:[%s314_s9] sm:$0x7] }
 0x17d   : > { %v661_v63 = vpop.f32.mrb[10].mxu1  ;;  %v1331_v61 = vpop.permute.xlu0 %1330 }
 0x17e   : > { %v1576_v0 = vpop.f32.mrb[11].mxu1 }
 0x17f   : > { %v1351_v0 = vsub.s32 2, %v1786_v4 }
 0x181   : > { %v727_v1 = vpop.f32.mrb[12].mxu0 }
 0x182   : > { %v774_v2 = vadd.f32 %v727_v1, %v664_v55  ;;  %v729_v3 = vpop.f32.mrb[13].mxu0 }
 0x183   : > { %v775_v5 = vadd.f32 %v729_v3, %v665_v57  ;;  %v731_v8 = vpop.f32.mrb[14].mxu0  ;;  %v768_v9 = vpop.f32.mrb[12].mxu1  ;;  %v1343_v57 = vsub.s32 0, %v1786_v4 }
 0x184   : > { %v776_v10 = vadd.f32 %v768_v9, %v666_v60  ;;  %v732_v11 = vpop.f32.mrb[15].mxu0  ;;  %v1581_v12 = vpop.f32.mrb[13].mxu1  ;;  %v1347_v60 = vsub.s32 1, %v1786_v4 }
 0x185   : > { %v771_v13 = vpop.f32.mrb[14].mxu1 }
 0x186   : > { %v1582_v14 = vpop.f32.mrb[15].mxu1  ;;  %v1348_v12 = vrot.slane %v1339_v59, %v1347_v60 }
 0x189   : > { %v837_v15 = vpop.f32.mrb[16].mxu0 }
 0x18a   : > { %v884_v16 = vadd.f32 %v837_v15, %v774_v2  ;;  %v839_v17 = vpop.f32.mrb[17].mxu0 }
 0x18b   : > { %v885_v18 = vadd.f32 %v839_v17, %v775_v5  ;;  %v841_v19 = vpop.f32.mrb[18].mxu0  ;;  %v878_v20 = vpop.f32.mrb[16].mxu1  ;;  %v1344_v5 = vrot.slane %v1339_v59, %v1343_v57  ;;  %v1352_v17 = vrot.slane %v1339_v59, %v1351_v0 }
 0x18c   : > { %v886_v21 = vadd.f32 %v878_v20, %v776_v10  ;;  %v842_v22 = vpop.f32.mrb[19].mxu0  ;;  %v1587_v23 = vpop.f32.mrb[17].mxu1 }
 0x18d   : > { %v881_v24 = vpop.f32.mrb[18].mxu1 }
 0x18e   : > { %v1588_v25 = vpop.f32.mrb[19].mxu1 }
 0x191   : > { %v947_v26 = vpop.f32.mrb[20].mxu0 }
 0x192   : > { %v994_v27 = vadd.f32 %v947_v26, %v884_v16  ;;  %v949_v28 = vpop.f32.mrb[21].mxu0 }
 0x193   : > { %v995_v29 = vadd.f32 %v949_v28, %v885_v18  ;;  %v951_v30 = vpop.f32.mrb[22].mxu0  ;;  %v988_v31 = vpop.f32.mrb[20].mxu1 }
 0x194   : > { %v996_v32 = vadd.f32 %v988_v31, %v886_v21  ;;  %v952_v33 = vpop.f32.mrb[23].mxu0  ;;  %v1593_v34 = vpop.f32.mrb[21].mxu1 }
 0x195   : > { %v991_v35 = vpop.f32.mrb[22].mxu1 }
 0x196   : > { %v1594_v36 = vpop.f32.mrb[23].mxu1 }
 0x199   : > { %v1057_v37 = vpop.f32.mrb[24].mxu0 }
 0x19a   : > { %v1104_v38 = vadd.f32 %v1057_v37, %v994_v27  ;;  %v1059_v39 = vpop.f32.mrb[25].mxu0 }
 0x19b   : > { %v1105_v40 = vadd.f32 %v1059_v39, %v995_v29  ;;  %v1061_v41 = vpop.f32.mrb[26].mxu0  ;;  %v1098_v7 = vpop.f32.mrb[24].mxu1 }
 0x19c   : > { %v1106_v42 = vadd.f32 %v1098_v7, %v996_v32  ;;  %v1062_v43 = vpop.f32.mrb[27].mxu0  ;;  %v1599_v44 = vpop.f32.mrb[25].mxu1 }
 0x19d   : > { %v1101_v45 = vpop.f32.mrb[26].mxu1 }
 0x19e   : > { %v1600_v46 = vpop.f32.mrb[27].mxu1 }
 0x1a1   : > { %v1167_v6 = vpop.f32.mrb[28].mxu0 }
 0x1a2   : > { %v1214_v47 = vadd.f32 %v1167_v6, %v1104_v38  ;;  %v1169_v48 = vpop.f32.mrb[29].mxu0 }
 0x1a3   : > { %v1215_v49 = vadd.f32 %v1169_v48, %v1105_v40  ;;  %v1171_v50 = vpop.f32.mrb[30].mxu0  ;;  %v1208_v51 = vpop.f32.mrb[28].mxu1 }
 0x1a4   : > { %v1216_v52 = vadd.f32 %v1208_v51, %v1106_v42  ;;  %v1172_v53 = vpop.f32.mrb[31].mxu0  ;;  %v1605_v54 = vpop.f32.mrb[29].mxu1 }
 0x1a5   : > { %v1211_v55 = vpop.f32.mrb[30].mxu1 }
 0x1a6   : > { %v1606_v56 = vpop.f32.mrb[31].mxu1 }
 0x1a9   : > { %v1277_v58 = vpop.f32.mrb[32].mxu0 }
 0x1aa   : > { %v1324_v62 = vadd.f32 %v1277_v58, %v1214_v47  ;;  %v1279_v63 = vpop.f32.mrb[33].mxu0 }
 0x1ab   : > { %v1325_v1 = vadd.f32 %v1279_v63, %v1215_v49  ;;  %v1281_v2 = vpop.f32.mrb[34].mxu0  ;;  %v1318_v3 = vpop.f32.mrb[32].mxu1 }
 0x1ac   : > { %v1333_v8 = vadd.f32 %v1331_v61, %v1324_v62  ;;  %v1326_v9 = vadd.f32 %v1318_v3, %v1216_v52  ;;  %v1282_v10 = vpop.f32.mrb[35].mxu0  ;;  %v1611_v11 = vpop.f32.mrb[33].mxu1 }
 0x1ad   : > { %v1334_v13 = vadd.f32 %v1331_v61, %v1325_v1  ;;  %v1321_v14 = vpop.f32.mrb[34].mxu1 }
 0x1ae   : > { %v1336_v15 = vmax.f32 %v1333_v8, 0.0  ;;  %v1335_v16 = vadd.f32 %v1331_v61, %v1326_v9  ;;  %v1612_v18 = vpop.f32.mrb[35].mxu1 }
 0x1af   : > { %v1337_v19 = vmax.f32 %v1334_v13, 0.0 }
 0x1b0   : > { %v1356_v20 = vmul.f32 %v1344_v5, %v1336_v15  ;;  %v1338_v4 = vmax.f32 %v1335_v16, 0.0 }
 0x1b1   : > { %v1357_v21 = vmul.f32 %v1348_v12, %v1337_v19 }
 0x1b2   : > { %v1358_v22 = vmul.f32 %v1352_v17, %v1338_v4 }
 0x1b3   : > { %v1539_v23 = vpack.c.bf16 %v1357_v21, %v1356_v20 }
 0x1b4   : > { %v1540_v24 = vpack.c.bf16 %v1358_v22, %v1358_v22 }
 0x1b5   : > { %1372 = vst [vmem:[%s324_s25] sm:$0xff] %v1539_v23 }
 0x1b6   : > { %1373 = vst [vmem:[%s324_s25 + $0x8] sm:$0xf] %v1540_v24 }
 0x1b7 PF: > { %s15_s22 = sadd.s32 1, %s1707_s22   ;;  %s1966_s18 = smov %s1699_s20 }
 0x1b8   : > { %p12_p9 = scmp.ge.s32.totalorder %s15_s22, 6   ;;  %s1967_s19 = smov %s1703_s21 }
 0x1b9   : > { %s1968_s20 = smov %s1971_s23  ;;  %s1969_s21 = smov %s1975_s24 }
 0x1ba   :  { %14 = sbr.rel (!%p12_p9) target bundleno = 3 (0x3), region = 84 }

</bundles_post_ra>
